<compile_context>
chip_gen: v5e
topology: v5e:2x2
jax: 0.10.0
libtpu: 0.0.40
codegen_flags: <defaults>
</compile_context>

<pallas_src>
import functools

import jax
import jax.numpy as jnp
from jax import lax
from jax.experimental import pallas as pl
from jax.experimental.pallas import tpu as pltpu

EPS = 1e-5      # nn.BatchNorm2d default eps
LANE = 128      # TPU lane width


def _round_up(x, m):
    return (x + m - 1) // m * m


def _pick_row_block(Ho, Wo, target_elems=2048):
    """Largest divisor d of Ho with d*Wo <= target and (d*Wo) % 8 == 0."""
    best = Ho
    for d in range(1, Ho + 1):
        if Ho % d == 0 and (d * Wo) % 8 == 0 and d * Wo <= target_elems:
            best = d
    return best


def _pick_m_block(M, target=2048):
    """Largest divisor of M that is a multiple of 128 and <= target."""
    best = M
    for d in range(1, M + 1):
        if M % d == 0 and d % 128 == 0 and d <= target:
            best = d
    return best


# ---------------------------------------------------------------------------
# Kernel 1: conv (single deep-contraction MXU dot) + per-tile centered stats
# ---------------------------------------------------------------------------
def _make_conv_stats_kernel(k, Ho_blk, Wo, Cin, cout_blk):
    kkc = k * k * Cin
    inv_n = 1.0 / float(Ho_blk * Wo)

    def kernel(x_ref, w_ref, y_ref, mu_ref, ss_ref):
        # x_ref : (Hp, Wp, Cin)        bf16  whole padded image (VMEM resident)
        # w_ref : (k*k*Cin, cout_blk)  bf16  resident (constant index_map)
        # y_ref : (Ho_blk*Wo, cout_blk) bf16 conv output tile
        # mu_ref/ss_ref : (1, cout_blk) f32  tile mean / centered sum-of-squares
        row0 = pl.program_id(2) * Ho_blk
        taps = []
        for kh in range(k):
            for kw in range(k):
                taps.append(x_ref[pl.ds(row0 + kh, Ho_blk), pl.ds(kw, Wo), :])
        patches = jnp.concatenate(taps, axis=-1)        # (Ho_blk, Wo, k*k*Cin)
        patches = patches.reshape(Ho_blk * Wo, kkc)     # leading-dims merge only
        acc = jnp.dot(patches, w_ref[...],
                      preferred_element_type=jnp.float32)   # f32 accumulator
        y_ref[...] = acc.astype(y_ref.dtype)            # bf16 intermediate
        mu = jnp.sum(acc, axis=0, keepdims=True) * inv_n
        d = acc - mu
        mu_ref[...] = mu
        ss_ref[...] = jnp.sum(d * d, axis=0, keepdims=True)

    return kernel


# ---------------------------------------------------------------------------
# Kernel 2: scale*y + shift, ReLU, in-kernel transpose to channel-major layout
# ---------------------------------------------------------------------------
def _bn_relu_transpose_kernel(y_ref, scale_ref, shift_ref, o_ref):
    # y_ref: (Mblk, cout_blk) bf16 ; scale/shift: (1, cout_blk) f32
    # o_ref: (cout_blk, Mblk) f32  -> output array is (B, Cout_pad, Ho*Wo)
    y = y_ref[...].astype(jnp.float32)
    z = jnp.maximum(y * scale_ref[...] + shift_ref[...], 0.0)
    o_ref[...] = z.T


# ---------------------------------------------------------------------------
# Wrapper
# ---------------------------------------------------------------------------
def conv_block_forward(x_nchw, w_hwio, gamma, beta, *, stride=1, padding=1):
    assert stride == 1, "fused kernel currently supports stride=1 only"

    B, Cin, H, W = x_nchw.shape
    k = w_hwio.shape[0]
    Cout = w_hwio.shape[-1]
    Ho = H + 2 * padding - k + 1
    Wo = W + 2 * padding - k + 1
    Hp, Wp = H + 2 * padding, W + 2 * padding
    M = B * Ho * Wo

    # Cout blocking: 256 lanes when it tiles cleanly (v6e/v7x MXU width).
    cout_blk = 256 if (Cout >= 256 and _round_up(Cout, 128) % 256 == 0) else LANE
    Cout_pad = _round_up(Cout, cout_blk)
    n_cblk = Cout_pad // cout_blk

    Ho_blk = _pick_row_block(Ho, Wo)
    n_row = Ho // Ho_blk
    n_tile = Ho_blk * Wo

    # Wrapper preprocessing (one fused XLA pass): NCHW->NHWC, zero pad, bf16.
    x = jnp.transpose(x_nchw, (0, 2, 3, 1)).astype(jnp.float32)
    xpad = jnp.pad(x, ((0, 0), (padding, padding),
                       (padding, padding), (0, 0))).astype(jnp.bfloat16)

    # Weights: pad Cout, flatten taps to the contraction axis -> (k*k*Cin, Cout_pad).
    w = jnp.pad(w_hwio.astype(jnp.float32),
                ((0, 0), (0, 0), (0, 0), (0, Cout_pad - Cout)))
    w = w.reshape(k * k * Cin, Cout_pad).astype(jnp.bfloat16)

    conv_kernel = _make_conv_stats_kernel(k, Ho_blk, Wo, Cin, cout_blk)

    # VMEM budget: double-buffered blocks + in-kernel temporaries, <= 50 MiB.
    blk1 = (Hp * Wp * Cin * 2 + k * k * Cin * cout_blk * 2
            + n_tile * cout_blk * 2 + 2 * cout_blk * 4)
    tmp1 = n_tile * k * k * Cin * 2 + n_tile * cout_blk * 4
    vmem1 = int(min(max(2 * blk1 + tmp1 + (4 << 20), 16 << 20), 50 << 20))

    y, mu_t, ss_t = pl.pallas_call(
        conv_kernel,
        grid=(B, n_cblk, n_row),
        in_specs=[
            # whole padded image; resident across inner cout/row axes
            pl.BlockSpec((None, Hp, Wp, Cin), lambda b, j, r: (b, 0, 0, 0)),
            # weight slab for this cout block; resident across the row axis
            pl.BlockSpec((k * k * Cin, cout_blk), lambda b, j, r: (0, j)),
        ],
        out_specs=(
            pl.BlockSpec((None, n_tile, cout_blk), lambda b, j, r: (b, r, j)),
            pl.BlockSpec((None, None, 1, cout_blk), lambda b, j, r: (b, r, 0, j)),
            pl.BlockSpec((None, None, 1, cout_blk), lambda b, j, r: (b, r, 0, j)),
        ),
        out_shape=(
            jax.ShapeDtypeStruct((B, Ho * Wo, Cout_pad), jnp.bfloat16),
            jax.ShapeDtypeStruct((B, n_row, 1, Cout_pad), jnp.float32),
            jax.ShapeDtypeStruct((B, n_row, 1, Cout_pad), jnp.float32),
        ),
        compiler_params=pltpu.CompilerParams(
            dimension_semantics=("parallel", "parallel", "parallel"),
            vmem_limit_bytes=vmem1),
        cost_estimate=pl.CostEstimate(
            flops=2 * M * (k * k * Cin) * Cout_pad,
            transcendentals=0,
            bytes_accessed=int(xpad.size * 2 + B * w.size * 2
                               + M * Cout_pad * 2 + 2 * B * n_row * Cout_pad * 4)),
    )(xpad, w)

    # ---- global BatchNorm statistics (parallel-variance combine, biased) ----
    n_tile_f = float(n_tile)
    mu_t = mu_t.reshape(B * n_row, Cout_pad)
    ss_t = ss_t.reshape(B * n_row, Cout_pad)
    mean = jnp.mean(mu_t, axis=0)                       # equal-size tiles
    var = (jnp.sum(ss_t, axis=0)
           + n_tile_f * jnp.sum((mu_t - mean) ** 2, axis=0)) / M
    var = jnp.maximum(var, 0.0)

    gamma_p = jnp.pad(gamma.astype(jnp.float32), (0, Cout_pad - Cout))
    beta_p = jnp.pad(beta.astype(jnp.float32), (0, Cout_pad - Cout))
    inv = lax.rsqrt(var + EPS)
    scale = (gamma_p * inv).reshape(1, Cout_pad)
    shift = (beta_p - mean * gamma_p * inv).reshape(1, Cout_pad)

    # ---- pass 2: normalize + ReLU + in-kernel transpose --------------------
    HW = Ho * Wo
    Mblk = _pick_m_block(HW)
    n_mblk = HW // Mblk
    blk2 = Mblk * cout_blk * 2 + cout_blk * Mblk * 4 + 2 * cout_blk * 4
    tmp2 = 2 * Mblk * cout_blk * 4
    vmem2 = int(min(max(2 * blk2 + tmp2 + (4 << 20), 16 << 20), 50 << 20))

    out = pl.pallas_call(
        _bn_relu_transpose_kernel,
        grid=(B, n_cblk, n_mblk),
        in_specs=[
            pl.BlockSpec((None, Mblk, cout_blk), lambda b, j, r: (b, r, j)),
            pl.BlockSpec((1, cout_blk), lambda b, j, r: (0, j)),   # resident
            pl.BlockSpec((1, cout_blk), lambda b, j, r: (0, j)),   # resident
        ],
        out_specs=pl.BlockSpec((None, cout_blk, Mblk), lambda b, j, r: (b, j, r)),
        out_shape=jax.ShapeDtypeStruct((B, Cout_pad, HW), jnp.float32),
        compiler_params=pltpu.CompilerParams(
            dimension_semantics=("parallel", "parallel", "parallel"),
            vmem_limit_bytes=vmem2),
        cost_estimate=pl.CostEstimate(
            flops=3 * B * HW * Cout_pad, transcendentals=0,
            bytes_accessed=int(B * HW * Cout_pad * 2 + B * HW * Cout_pad * 4)),
    )(y, scale, shift)

    # Channel slice (identity when Cout == Cout_pad) + reshape -> NCHW.
    # The spatial-vs-channel transpose already happened in-kernel.
    return out[:, :Cout, :].reshape(B, Cout, Ho, Wo)


# ---------------------------------------------------------------------------
# Pure-JAX reference (f32) for correctness checking
# ---------------------------------------------------------------------------
def ref_forward(x_nchw, w_hwio, gamma, beta, stride=1, padding=1):
    x = jnp.transpose(x_nchw, (0, 2, 3, 1)).astype(jnp.float32)
    y = lax.conv_general_dilated(
        x, w_hwio.astype(jnp.float32), (stride, stride),
        [(padding, padding), (padding, padding)],
        dimension_numbers=("NHWC", "HWIO", "NHWC"))
    mean = jnp.mean(y, axis=(0, 1, 2), keepdims=True)
    var = jnp.mean((y - mean) ** 2, axis=(0, 1, 2), keepdims=True)
    y = (y - mean) * lax.rsqrt(var + EPS) * gamma + beta
    y = jnp.maximum(y, 0.0)
    return jnp.transpose(y, (0, 3, 1, 2))


# ---------------------------------------------------------------------------
if __name__ == "__main__":
    B, Cin, Cout, H, W = 2, 4, 8, 16, 16

    key = jax.random.PRNGKey(0)
    kx, kw = jax.random.split(key)
    x = jax.random.normal(kx, (B, Cin, H, W), jnp.float32)            # NCHW
    w = 0.1 * jax.random.normal(kw, (3, 3, Cin, Cout), jnp.float32)   # HWIO
    gamma = jnp.ones((Cout,), jnp.float32)    # fresh BatchNorm2d affine
    beta = jnp.zeros((Cout,), jnp.float32)

    fwd = jax.jit(functools.partial(conv_block_forward, stride=1, padding=1))
    out = jax.block_until_ready(fwd(x, w, gamma, beta))

    ref = jax.block_until_ready(ref_forward(x, w, gamma, beta))
    assert out.shape == (B, Cout, H, W), out.shape
    max_err = float(jnp.max(jnp.abs(out - ref)))
    # bf16 MXU inputs + bf16 intermediate y => relaxed tolerance vs f32 ref.
    assert max_err < 6e-2, f"max abs err {max_err}"

    print("KERNEL_OK")
</pallas_src>

<mosaic_0001>
module attributes {stable_mosaic.version = 11 : i64} {
  func.func @kernel(%arg0: i32, %arg1: i32, %arg2: i32, %arg3: memref<1x18x18x4xbf16, #tpu.memory_space<vmem>>, %arg4: memref<36x128xbf16, #tpu.memory_space<vmem>>, %arg5: memref<1x256x128xbf16, #tpu.memory_space<vmem>>, %arg6: memref<1x1x1x128xf32, #tpu.memory_space<vmem>>, %arg7: memref<1x1x1x128xf32, #tpu.memory_space<vmem>>) attributes {dimension_semantics = [#tpu.dimension_semantics<parallel>, #tpu.dimension_semantics<parallel>, #tpu.dimension_semantics<parallel>], iteration_bounds = array<i64: 2, 1, 1>, scalar_prefetch = 0 : i64, scratch_operands = 0 : i64, tpu.core_type = #tpu.core_type<tc>, window_params = [{transform_indices = @transform_0, window_bounds = array<i64: 1, 18, 18, 4>}, {transform_indices = @transform_1, window_bounds = array<i64: 36, 128>}, {transform_indices = @transform_2, window_bounds = array<i64: 1, 256, 128>}, {transform_indices = @transform_3, window_bounds = array<i64: 1, 1, 1, 128>}, {transform_indices = @transform_4, window_bounds = array<i64: 1, 1, 1, 128>}]} {
    %c16_i32 = arith.constant 16 : i32
    %0 = arith.muli %arg2, %c16_i32 : i32
    %c0_i32 = arith.constant 0 : i32
    %1 = arith.addi %0, %c0_i32 : i32
    %c0 = arith.constant 0 : index
    %2 = arith.index_cast %1 : i32 to index
    %c0_0 = arith.constant 0 : index
    %c0_1 = arith.constant 0 : index
    %3 = vector.load %arg3[%c0, %2, %c0_0, %c0_1] : memref<1x18x18x4xbf16, #tpu.memory_space<vmem>>, vector<1x16x16x4xbf16>
    %4 = vector.shape_cast %3 : vector<1x16x16x4xbf16> to vector<16x16x4xbf16>
    %c0_i32_2 = arith.constant 0 : i32
    %5 = arith.addi %0, %c0_i32_2 : i32
    %c0_3 = arith.constant 0 : index
    %6 = arith.index_cast %5 : i32 to index
    %c1 = arith.constant 1 : index
    %c0_4 = arith.constant 0 : index
    %7 = vector.load %arg3[%c0_3, %6, %c1, %c0_4] : memref<1x18x18x4xbf16, #tpu.memory_space<vmem>>, vector<1x16x16x4xbf16>
    %8 = vector.shape_cast %7 : vector<1x16x16x4xbf16> to vector<16x16x4xbf16>
    %c0_i32_5 = arith.constant 0 : i32
    %9 = arith.addi %0, %c0_i32_5 : i32
    %c0_6 = arith.constant 0 : index
    %10 = arith.index_cast %9 : i32 to index
    %c2 = arith.constant 2 : index
    %c0_7 = arith.constant 0 : index
    %11 = vector.load %arg3[%c0_6, %10, %c2, %c0_7] : memref<1x18x18x4xbf16, #tpu.memory_space<vmem>>, vector<1x16x16x4xbf16>
    %12 = vector.shape_cast %11 : vector<1x16x16x4xbf16> to vector<16x16x4xbf16>
    %c1_i32 = arith.constant 1 : i32
    %13 = arith.addi %0, %c1_i32 : i32
    %c0_8 = arith.constant 0 : index
    %14 = arith.index_cast %13 : i32 to index
    %c0_9 = arith.constant 0 : index
    %c0_10 = arith.constant 0 : index
    %15 = vector.load %arg3[%c0_8, %14, %c0_9, %c0_10] : memref<1x18x18x4xbf16, #tpu.memory_space<vmem>>, vector<1x16x16x4xbf16>
    %16 = vector.shape_cast %15 : vector<1x16x16x4xbf16> to vector<16x16x4xbf16>
    %c1_i32_11 = arith.constant 1 : i32
    %17 = arith.addi %0, %c1_i32_11 : i32
    %c0_12 = arith.constant 0 : index
    %18 = arith.index_cast %17 : i32 to index
    %c1_13 = arith.constant 1 : index
    %c0_14 = arith.constant 0 : index
    %19 = vector.load %arg3[%c0_12, %18, %c1_13, %c0_14] : memref<1x18x18x4xbf16, #tpu.memory_space<vmem>>, vector<1x16x16x4xbf16>
    %20 = vector.shape_cast %19 : vector<1x16x16x4xbf16> to vector<16x16x4xbf16>
    %c1_i32_15 = arith.constant 1 : i32
    %21 = arith.addi %0, %c1_i32_15 : i32
    %c0_16 = arith.constant 0 : index
    %22 = arith.index_cast %21 : i32 to index
    %c2_17 = arith.constant 2 : index
    %c0_18 = arith.constant 0 : index
    %23 = vector.load %arg3[%c0_16, %22, %c2_17, %c0_18] : memref<1x18x18x4xbf16, #tpu.memory_space<vmem>>, vector<1x16x16x4xbf16>
    %24 = vector.shape_cast %23 : vector<1x16x16x4xbf16> to vector<16x16x4xbf16>
    %c2_i32 = arith.constant 2 : i32
    %25 = arith.addi %0, %c2_i32 : i32
    %c0_19 = arith.constant 0 : index
    %26 = arith.index_cast %25 : i32 to index
    %c0_20 = arith.constant 0 : index
    %c0_21 = arith.constant 0 : index
    %27 = vector.load %arg3[%c0_19, %26, %c0_20, %c0_21] : memref<1x18x18x4xbf16, #tpu.memory_space<vmem>>, vector<1x16x16x4xbf16>
    %28 = vector.shape_cast %27 : vector<1x16x16x4xbf16> to vector<16x16x4xbf16>
    %c2_i32_22 = arith.constant 2 : i32
    %29 = arith.addi %0, %c2_i32_22 : i32
    %c0_23 = arith.constant 0 : index
    %30 = arith.index_cast %29 : i32 to index
    %c1_24 = arith.constant 1 : index
    %c0_25 = arith.constant 0 : index
    %31 = vector.load %arg3[%c0_23, %30, %c1_24, %c0_25] : memref<1x18x18x4xbf16, #tpu.memory_space<vmem>>, vector<1x16x16x4xbf16>
    %32 = vector.shape_cast %31 : vector<1x16x16x4xbf16> to vector<16x16x4xbf16>
    %c2_i32_26 = arith.constant 2 : i32
    %33 = arith.addi %0, %c2_i32_26 : i32
    %c0_27 = arith.constant 0 : index
    %34 = arith.index_cast %33 : i32 to index
    %c2_28 = arith.constant 2 : index
    %c0_29 = arith.constant 0 : index
    %35 = vector.load %arg3[%c0_27, %34, %c2_28, %c0_29] : memref<1x18x18x4xbf16, #tpu.memory_space<vmem>>, vector<1x16x16x4xbf16>
    %36 = vector.shape_cast %35 : vector<1x16x16x4xbf16> to vector<16x16x4xbf16>
    %37 = tpu.concatenate %4, %8, %12, %16, %20, %24, %28, %32, %36 in 2 : vector<16x16x4xbf16>, vector<16x16x4xbf16>, vector<16x16x4xbf16>, vector<16x16x4xbf16>, vector<16x16x4xbf16>, vector<16x16x4xbf16>, vector<16x16x4xbf16>, vector<16x16x4xbf16>, vector<16x16x4xbf16> -> vector<16x16x36xbf16>
    %38 = vector.shape_cast %37 : vector<16x16x36xbf16> to vector<256x36xbf16>
    %c0_30 = arith.constant 0 : index
    %c0_31 = arith.constant 0 : index
    %39 = vector.load %arg4[%c0_30, %c0_31] : memref<36x128xbf16, #tpu.memory_space<vmem>>, vector<36x128xbf16>
    %cst = arith.constant dense<0.000000e+00> : vector<256x128xf32>
    %40 = tpu.matmul %38, %39, %cst {dimension_numbers = #tpu.dot_dimension_numbers<[1], [0], [0], [1], [0, 0, 1, 1], [], []>} : vector<256x36xbf16>, vector<36x128xbf16>, vector<256x128xf32> -> vector<256x128xf32>
    %41 = arith.truncf %40 : vector<256x128xf32> to vector<256x128xbf16>
    %c0_32 = arith.constant 0 : index
    %c0_33 = arith.constant 0 : index
    %c0_34 = arith.constant 0 : index
    %42 = vector.load %arg5[%c0_32, %c0_33, %c0_34] : memref<1x256x128xbf16, #tpu.memory_space<vmem>>, vector<1x256x128xbf16>
    %43 = vector.shape_cast %42 : vector<1x256x128xbf16> to vector<256x128xbf16>
    %44 = vector.shape_cast %41 : vector<256x128xbf16> to vector<1x256x128xbf16>
    tpu.vector_store %arg5[%c0_32, %c0_33, %c0_34], %44 {strides = array<i32>} : memref<1x256x128xbf16, #tpu.memory_space<vmem>>, vector<1x256x128xbf16>,
    %cst_35 = arith.constant dense<0.000000e+00> : vector<128xf32>
    %45 = vector.multi_reduction <add>, %40, %cst_35 [0] : vector<256x128xf32> to vector<128xf32>
    %46 = vector.shape_cast %45 : vector<128xf32> to vector<1x128xf32>
    %cst_36 = arith.constant 3.906250e-03 : f32
    %47 = vector.broadcast %cst_36 : f32 to vector<1x128xf32>
    %48 = arith.mulf %46, %47 : vector<1x128xf32>
    %49 = vector.broadcast %48 : vector<1x128xf32> to vector<256x128xf32>
    %50 = arith.subf %40, %49 : vector<256x128xf32>
    %c0_37 = arith.constant 0 : index
    %c0_38 = arith.constant 0 : index
    %c0_39 = arith.constant 0 : index
    %c0_40 = arith.constant 0 : index
    %51 = vector.load %arg6[%c0_37, %c0_38, %c0_39, %c0_40] : memref<1x1x1x128xf32, #tpu.memory_space<vmem>>, vector<1x1x1x128xf32>
    %52 = vector.shape_cast %51 : vector<1x1x1x128xf32> to vector<1x128xf32>
    %53 = vector.shape_cast %48 : vector<1x128xf32> to vector<1x1x1x128xf32>
    tpu.vector_store %arg6[%c0_37, %c0_38, %c0_39, %c0_40], %53 {strides = array<i32>} : memref<1x1x1x128xf32, #tpu.memory_space<vmem>>, vector<1x1x1x128xf32>,
    %54 = arith.mulf %50, %50 : vector<256x128xf32>
    %cst_41 = arith.constant dense<0.000000e+00> : vector<128xf32>
    %55 = vector.multi_reduction <add>, %54, %cst_41 [0] : vector<256x128xf32> to vector<128xf32>
    %56 = vector.shape_cast %55 : vector<128xf32> to vector<1x128xf32>
    %c0_42 = arith.constant 0 : index
    %c0_43 = arith.constant 0 : index
    %c0_44 = arith.constant 0 : index
    %c0_45 = arith.constant 0 : index
    %57 = vector.load %arg7[%c0_42, %c0_43, %c0_44, %c0_45] : memref<1x1x1x128xf32, #tpu.memory_space<vmem>>, vector<1x1x1x128xf32>
    %58 = vector.shape_cast %57 : vector<1x1x1x128xf32> to vector<1x128xf32>
    %59 = vector.shape_cast %56 : vector<1x128xf32> to vector<1x1x1x128xf32>
    tpu.vector_store %arg7[%c0_42, %c0_43, %c0_44, %c0_45], %59 {strides = array<i32>} : memref<1x1x1x128xf32, #tpu.memory_space<vmem>>, vector<1x1x1x128xf32>,
    return
  }
  func.func @transform_0(%arg0: i32, %arg1: i32, %arg2: i32) -> (i32, i32, i32, i32) {
    %c0_i32 = arith.constant 0 : i32
    %c0_i32_0 = arith.constant 0 : i32
    %c0_i32_1 = arith.constant 0 : i32
    %c0_i32_2 = arith.constant 0 : i32
    return %arg0, %c0_i32, %c0_i32_0, %c0_i32_1 : i32, i32, i32, i32
  }
  func.func @transform_1(%arg0: i32, %arg1: i32, %arg2: i32) -> (i32, i32) {
    %c0_i32 = arith.constant 0 : i32
    %c0_i32_0 = arith.constant 0 : i32
    return %c0_i32, %arg1 : i32, i32
  }
  func.func @transform_2(%arg0: i32, %arg1: i32, %arg2: i32) -> (i32, i32, i32) {
    %c0_i32 = arith.constant 0 : i32
    return %arg0, %arg2, %arg1 : i32, i32, i32
  }
  func.func @transform_3(%arg0: i32, %arg1: i32, %arg2: i32) -> (i32, i32, i32, i32) {
    %c0_i32 = arith.constant 0 : i32
    %c0_i32_0 = arith.constant 0 : i32
    return %arg0, %arg2, %c0_i32, %arg1 : i32, i32, i32, i32
  }
  func.func @transform_4(%arg0: i32, %arg1: i32, %arg2: i32) -> (i32, i32, i32, i32) {
    %c0_i32 = arith.constant 0 : i32
    %c0_i32_0 = arith.constant 0 : i32
    return %arg0, %arg2, %c0_i32, %arg1 : i32, i32, i32, i32
  }
}

module attributes {stable_mosaic.version = 11 : i64} {
  func.func @_bn_relu_transpose_kernel(%arg0: i32, %arg1: i32, %arg2: i32, %arg3: memref<1x256x128xbf16, #tpu.memory_space<vmem>>, %arg4: memref<1x128xf32, #tpu.memory_space<vmem>>, %arg5: memref<1x128xf32, #tpu.memory_space<vmem>>, %arg6: memref<1x128x256xf32, #tpu.memory_space<vmem>>) attributes {dimension_semantics = [#tpu.dimension_semantics<parallel>, #tpu.dimension_semantics<parallel>, #tpu.dimension_semantics<parallel>], iteration_bounds = array<i64: 2, 1, 1>, scalar_prefetch = 0 : i64, scratch_operands = 0 : i64, tpu.core_type = #tpu.core_type<tc>, window_params = [{transform_indices = @transform_0, window_bounds = array<i64: 1, 256, 128>}, {transform_indices = @transform_1, window_bounds = array<i64: 1, 128>}, {transform_indices = @transform_2, window_bounds = array<i64: 1, 128>}, {transform_indices = @transform_3, window_bounds = array<i64: 1, 128, 256>}]} {
    %c0 = arith.constant 0 : index
    %c0_0 = arith.constant 0 : index
    %c0_1 = arith.constant 0 : index
    %0 = vector.load %arg3[%c0, %c0_0, %c0_1] : memref<1x256x128xbf16, #tpu.memory_space<vmem>>, vector<1x256x128xbf16>
    %1 = vector.shape_cast %0 : vector<1x256x128xbf16> to vector<256x128xbf16>
    %2 = arith.extf %1 : vector<256x128xbf16> to vector<256x128xf32>
    %c0_2 = arith.constant 0 : index
    %c0_3 = arith.constant 0 : index
    %3 = vector.load %arg4[%c0_2, %c0_3] : memref<1x128xf32, #tpu.memory_space<vmem>>, vector<1x128xf32>
    %4 = vector.broadcast %3 : vector<1x128xf32> to vector<256x128xf32>
    %5 = arith.mulf %2, %4 : vector<256x128xf32>
    %c0_4 = arith.constant 0 : index
    %c0_5 = arith.constant 0 : index
    %6 = vector.load %arg5[%c0_4, %c0_5] : memref<1x128xf32, #tpu.memory_space<vmem>>, vector<1x128xf32>
    %7 = vector.broadcast %6 : vector<1x128xf32> to vector<256x128xf32>
    %8 = arith.addf %5, %7 : vector<256x128xf32>
    %cst = arith.constant 0.000000e+00 : f32
    %9 = vector.broadcast %cst : f32 to vector<256x128xf32>
    %10 = arith.maximumf %8, %9 : vector<256x128xf32>
    %11 = tpu.transpose %10, [1, 0] : vector<256x128xf32> -> vector<128x256xf32>
    %c0_6 = arith.constant 0 : index
    %c0_7 = arith.constant 0 : index
    %c0_8 = arith.constant 0 : index
    %12 = vector.load %arg6[%c0_6, %c0_7, %c0_8] : memref<1x128x256xf32, #tpu.memory_space<vmem>>, vector<1x128x256xf32>
    %13 = vector.shape_cast %12 : vector<1x128x256xf32> to vector<128x256xf32>
    %14 = vector.shape_cast %11 : vector<128x256xf32> to vector<1x128x256xf32>
    tpu.vector_store %arg6[%c0_6, %c0_7, %c0_8], %14 {strides = array<i32>} : memref<1x128x256xf32, #tpu.memory_space<vmem>>, vector<1x128x256xf32>,
    return
  }
  func.func @transform_0(%arg0: i32, %arg1: i32, %arg2: i32) -> (i32, i32, i32) {
    %c0_i32 = arith.constant 0 : i32
    return %arg0, %arg2, %arg1 : i32, i32, i32
  }
  func.func @transform_1(%arg0: i32, %arg1: i32, %arg2: i32) -> (i32, i32) {
    %c0_i32 = arith.constant 0 : i32
    %c0_i32_0 = arith.constant 0 : i32
    return %c0_i32, %arg1 : i32, i32
  }
  func.func @transform_2(%arg0: i32, %arg1: i32, %arg2: i32) -> (i32, i32) {
    %c0_i32 = arith.constant 0 : i32
    %c0_i32_0 = arith.constant 0 : i32
    return %c0_i32, %arg1 : i32, i32
  }
  func.func @transform_3(%arg0: i32, %arg1: i32, %arg2: i32) -> (i32, i32, i32) {
    %c0_i32 = arith.constant 0 : i32
    return %arg0, %arg1, %arg2 : i32, i32, i32
  }
}

</mosaic_0001>

<bundles_post_ra>
// kernel: conv_block_forward.3
= control target key start
LH: loop header
LB: loop body
LE: loop exit
PB: predicated region body
PF: predicated region fallthrough
CT: control target
= control target key end

     0   :  { %s833_s12 = smov 0   ;;  %s835_s13 = smov 0   ;;  %s996_s0 = inlined_call_operand.vmem [shape: bf16[2,256,128], index: 0, kind: input, shape index: {}]   ;;  %s997_s1 = inlined_call_operand.vmem [shape: f32[1,128], index: 1, kind: input, shape index: {}]   ;;  %s998_s2 = inlined_call_operand.vmem [shape: f32[1,128], index: 2, kind: input, shape index: {}]   ;;  %s999_s3 = inlined_call_operand.vmem [shape: f32[2,128,256], index: 3, kind: output, shape index: {}]  }
   0x1   :  { %s837_s14 = smov 0  }
   0x2 LB: > { %s32_s15 = sadd.s32 1, %s807_s13  ;;  %p675_p0 = scmp.ge.s32.totalorder %s811_s14, 1  ;;  %s811_s14 = sphi %s837_s14, %s13_s14   ;;  %s807_s13 = sphi %s835_s13, %s1001_s13   ;;  %s803_s12 = sphi %s833_s12, %s1000_s12  }
   0x3   : > { %p34_p1 = scmp.ge.s32.totalorder %s32_s15, 2  ;;  %p188_p2 = scmp.lt.s32.totalorder %s811_s14, 3 }
   0x5   : > { %s1003_s15 = smov (%p34_p1, %s32_s15), 0  ;;  %p189_p3 = pnand %p675_p0, %p188_p2 }
   0x6   : > { %p235_p4 = scmp.lt.s32.totalorder (!%p189_p3), %s803_s12, 1 }
   0x7   : > { %192 = sbr.rel (%p189_p3) target bundleno = 311 (0x137), region = 32 }
   0xc   : > { %s1005_s12 = smov (!%p235_p4, %s803_s12), 1  ;;  %v862_v0 = vld [vmem:[%s997_s1] ss:$0 sm:$0xff] }
   0xd   : > { %s682_s16 = sshll.u32 %s1005_s12, 7  ;;  %v869_v4 = vld [vmem:[%s998_s2] ss:$0 sm:$0xff]  ;;  %s683_s24 = sshll.u32 %s1005_s12, 8 }
   0xe   : > { %s857_s19 = scalar_lea.vmem %s996_s0, %s682_s16  ;;  %s953_s27 = scalar_lea.vmem %s999_s3, %s683_s24 }
   0xf   : > { %v755_v1 = vld [vmem:[%s857_s19 + $0x40] sm:$0xff]   ;;  %v756_v14 = vld [vmem:[%s857_s19 + $0x48] sm:$0xff]   ;;  %v757_v34 = vld [vmem:[%s857_s19 + $0x50] sm:$0xff]  }
  0x10   : > { %v685_v2 = vld [vmem:[%s857_s19] sm:$0xff]   ;;  %v718_v3 = vunpack.c.l.bf16 %v755_v1  ;;  %v719_v6 = vunpack.c.h.bf16 %v755_v1  ;;  %v748_v15 = vld [vmem:[%s857_s19 + $0x8] sm:$0xff]   ;;  %v722_v20 = vunpack.c.l.bf16 %v756_v14  ;;  %v723_v28 = vunpack.c.h.bf16 %v756_v14  ;;  %v749_v35 = vld [vmem:[%s857_s19 + $0x10] sm:$0xff]  }
  0x11   : > { %v686_v5 = vunpack.c.l.bf16 %v685_v2  ;;  %v687_v7 = vunpack.c.h.bf16 %v685_v2  ;;  %v690_v21 = vunpack.c.l.bf16 %v748_v15  ;;  %v691_v29 = vunpack.c.h.bf16 %v748_v15  ;;  %v758_v52 = vld [vmem:[%s857_s19 + $0x58] sm:$0xff]  }
  0x12   : > { %v353_v8 = vmul.f32 %v862_v0, %v718_v3  ;;  %v354_v12 = vmul.f32 %v862_v0, %v719_v6  ;;  %v355_v24 = vmul.f32 %v862_v0, %v722_v20  ;;  %v356_v32 = vmul.f32 %v862_v0, %v723_v28  ;;  %v750_v53 = vld [vmem:[%s857_s19 + $0x18] sm:$0xff]  }
  0x13   : > { %v337_v9 = vmul.f32 %v862_v0, %v686_v5  ;;  %v338_v13 = vmul.f32 %v862_v0, %v687_v7  ;;  %v339_v25 = vmul.f32 %v862_v0, %v690_v21  ;;  %v340_v33 = vmul.f32 %v862_v0, %v691_v29 }
  0x14   : > { %v389_v10 = vadd.f32 %v869_v4, %v353_v8  ;;  %v390_v18 = vadd.f32 %v869_v4, %v354_v12  ;;  %v391_v26 = vadd.f32 %v869_v4, %v355_v24  ;;  %v392_v36 = vadd.f32 %v869_v4, %v356_v32  ;;  %v759_v8 = vld [vmem:[%s857_s19 + $0x60] sm:$0xff]  }
  0x15   : > { %v373_v11 = vadd.f32 %v869_v4, %v337_v9  ;;  %v374_v19 = vadd.f32 %v869_v4, %v338_v13  ;;  %v375_v27 = vadd.f32 %v869_v4, %v339_v25  ;;  %v376_v37 = vadd.f32 %v869_v4, %v340_v33  ;;  %v751_v9 = vld [vmem:[%s857_s19 + $0x20] sm:$0xff]  }
  0x16   : > { %v421_v16 = vmax.f32 %v389_v10, 0.0  ;;  %v422_v22 = vmax.f32 %v390_v18, 0.0  ;;  %v423_v30 = vmax.f32 %v391_v26, 0.0  ;;  %v726_v38 = vunpack.c.l.bf16 %v757_v34  ;;  %v760_v26 = vld [vmem:[%s857_s19 + $0x68] sm:$0xff]  }
  0x17   : > { %v405_v17 = vmax.f32 %v373_v11, 0.0  ;;  %v406_v23 = vmax.f32 %v374_v19, 0.0  ;;  %v407_v31 = vmax.f32 %v375_v27, 0.0  ;;  %v694_v39 = vunpack.c.l.bf16 %v749_v35  ;;  %v752_v27 = vld [vmem:[%s857_s19 + $0x28] sm:$0xff]  }
  0x18   : > { %469 = vxpose.xlu1.b32.start [1/16] %v421_v16, 128  ;;  %v424_v40 = vmax.f32 %v392_v36, 0.0  ;;  %v408_v41 = vmax.f32 %v376_v37, 0.0  ;;  %v357_v42 = vmul.f32 %v862_v0, %v726_v38  ;;  %v727_v46 = vunpack.c.h.bf16 %v757_v34 }
  0x19   : > { %437 = vxpose.xlu0.b32.start [1/16] %v405_v17, 128  ;;  %v341_v43 = vmul.f32 %v862_v0, %v694_v39  ;;  %v695_v47 = vunpack.c.h.bf16 %v749_v35  ;;  %v730_v56 = vunpack.c.l.bf16 %v758_v52  ;;  %v698_v57 = vunpack.c.l.bf16 %v750_v53 }
  0x1a   : > { %v393_v44 = vadd.f32 %v869_v4, %v357_v42  ;;  %v358_v50 = vmul.f32 %v862_v0, %v727_v46  ;;  %v731_v1 = vunpack.c.h.bf16 %v758_v52  ;;  %v699_v2 = vunpack.c.h.bf16 %v750_v53 }
  0x1b   : > { %v377_v45 = vadd.f32 %v869_v4, %v341_v43  ;;  %v342_v51 = vmul.f32 %v862_v0, %v695_v47  ;;  %v359_v60 = vmul.f32 %v862_v0, %v730_v56  ;;  %v343_v61 = vmul.f32 %v862_v0, %v698_v57 }
  0x1c   : > { %v425_v48 = vmax.f32 %v393_v44, 0.0  ;;  %v394_v54 = vadd.f32 %v869_v4, %v358_v50  ;;  %v360_v6 = vmul.f32 %v862_v0, %v731_v1  ;;  %v344_v7 = vmul.f32 %v862_v0, %v699_v2  ;;  %v761_v44 = vld [vmem:[%s857_s19 + $0x70] sm:$0xff]  }
  0x1d   : > { %v409_v49 = vmax.f32 %v377_v45, 0.0  ;;  %v378_v55 = vadd.f32 %v869_v4, %v342_v51  ;;  %v395_v62 = vadd.f32 %v869_v4, %v359_v60  ;;  %v379_v63 = vadd.f32 %v869_v4, %v343_v61  ;;  %v753_v45 = vld [vmem:[%s857_s19 + $0x30] sm:$0xff]  }
  0x1e   : > { %v426_v58 = vmax.f32 %v394_v54, 0.0  ;;  %v396_v10 = vadd.f32 %v869_v4, %v360_v6  ;;  %v380_v11 = vadd.f32 %v869_v4, %v344_v7  ;;  %v734_v12 = vunpack.c.l.bf16 %v759_v8 }
  0x1f   : > { %v410_v59 = vmax.f32 %v378_v55, 0.0  ;;  %v427_v3 = vmax.f32 %v395_v62, 0.0  ;;  %v411_v5 = vmax.f32 %v379_v63, 0.0  ;;  %v702_v13 = vunpack.c.l.bf16 %v751_v9  ;;  %v762_v62 = vld [vmem:[%s857_s19 + $0x78] sm:$0xff]  }
  0x20   : > { %470 = vxpose.xlu1.b32.cont [2/16] %v422_v22, 128  ;;  %v428_v14 = vmax.f32 %v396_v10, 0.0  ;;  %v412_v15 = vmax.f32 %v380_v11, 0.0  ;;  %v361_v16 = vmul.f32 %v862_v0, %v734_v12  ;;  %v735_v20 = vunpack.c.h.bf16 %v759_v8  ;;  %v754_v63 = vld [vmem:[%s857_s19 + $0x38] sm:$0xff]  }
  0x21   : > { %438 = vxpose.xlu0.b32.cont [2/16] %v406_v23, 128  ;;  %v345_v17 = vmul.f32 %v862_v0, %v702_v13  ;;  %v703_v21 = vunpack.c.h.bf16 %v751_v9  ;;  %v739_v38 = vunpack.c.h.bf16 %v760_v26  ;;  %v707_v39 = vunpack.c.h.bf16 %v752_v27 }
  0x22   : > { %v397_v18 = vadd.f32 %v869_v4, %v361_v16  ;;  %v362_v24 = vmul.f32 %v862_v0, %v735_v20  ;;  %v743_v56 = vunpack.c.h.bf16 %v761_v44  ;;  %v711_v57 = vunpack.c.h.bf16 %v753_v45 }
  0x23   : > { %v381_v19 = vadd.f32 %v869_v4, %v345_v17  ;;  %v346_v25 = vmul.f32 %v862_v0, %v703_v21  ;;  %v364_v42 = vmul.f32 %v862_v0, %v739_v38  ;;  %v348_v43 = vmul.f32 %v862_v0, %v707_v39 }
  0x24   : > { %v429_v22 = vmax.f32 %v397_v18, 0.0  ;;  %v398_v28 = vadd.f32 %v869_v4, %v362_v24  ;;  %v366_v60 = vmul.f32 %v862_v0, %v743_v56  ;;  %v350_v61 = vmul.f32 %v862_v0, %v711_v57 }
  0x25   : > { %v413_v23 = vmax.f32 %v381_v19, 0.0  ;;  %v382_v29 = vadd.f32 %v869_v4, %v346_v25  ;;  %v400_v46 = vadd.f32 %v869_v4, %v364_v42  ;;  %v384_v47 = vadd.f32 %v869_v4, %v348_v43 }
  0x26   : > { %v430_v32 = vmax.f32 %v398_v28, 0.0  ;;  %v402_v1 = vadd.f32 %v869_v4, %v366_v60  ;;  %v386_v2 = vadd.f32 %v869_v4, %v350_v61  ;;  %v747_v12 = vunpack.c.h.bf16 %v762_v62 }
  0x27   : > { %v414_v33 = vmax.f32 %v382_v29, 0.0  ;;  %v432_v50 = vmax.f32 %v400_v46, 0.0  ;;  %v416_v51 = vmax.f32 %v384_v47, 0.0  ;;  %v715_v13 = vunpack.c.h.bf16 %v754_v63 }
  0x28   : > { %471 = vxpose.xlu1.b32.cont [3/16] %v423_v30, 128  ;;  %v738_v30 = vunpack.c.l.bf16 %v760_v26  ;;  %v434_v6 = vmax.f32 %v402_v1, 0.0  ;;  %v418_v7 = vmax.f32 %v386_v2, 0.0  ;;  %v368_v16 = vmul.f32 %v862_v0, %v747_v12 }
  0x29   : > { %439 = vxpose.xlu0.b32.cont [3/16] %v407_v31, 128  ;;  %v706_v31 = vunpack.c.l.bf16 %v752_v27  ;;  %v352_v17 = vmul.f32 %v862_v0, %v715_v13 }
  0x2a   : > { %v363_v34 = vmul.f32 %v862_v0, %v738_v30  ;;  %v404_v18 = vadd.f32 %v869_v4, %v368_v16 }
  0x2b   : > { %v347_v35 = vmul.f32 %v862_v0, %v706_v31  ;;  %v388_v19 = vadd.f32 %v869_v4, %v352_v17 }
  0x2c   : > { %v399_v36 = vadd.f32 %v869_v4, %v363_v34  ;;  %v436_v20 = vmax.f32 %v404_v18, 0.0 }
  0x2d   : > { %v383_v37 = vadd.f32 %v869_v4, %v347_v35  ;;  %v420_v21 = vmax.f32 %v388_v19, 0.0 }
  0x30   : > { %472 = vxpose.xlu1.b32.cont [4/16] %v424_v40, 128  ;;  %v431_v40 = vmax.f32 %v399_v36, 0.0 }
  0x31   : > { %440 = vxpose.xlu0.b32.cont [4/16] %v408_v41, 128  ;;  %v415_v41 = vmax.f32 %v383_v37, 0.0 }
  0x38   : > { %473 = vxpose.xlu1.b32.cont [5/16] %v425_v48, 128  ;;  %v742_v48 = vunpack.c.l.bf16 %v761_v44 }
  0x39   : > { %441 = vxpose.xlu0.b32.cont [5/16] %v409_v49, 128  ;;  %v710_v49 = vunpack.c.l.bf16 %v753_v45 }
  0x3a   : > { %v365_v52 = vmul.f32 %v862_v0, %v742_v48 }
  0x3b   : > { %v349_v53 = vmul.f32 %v862_v0, %v710_v49 }
  0x3c   : > { %v401_v54 = vadd.f32 %v869_v4, %v365_v52 }
  0x3d   : > { %v385_v55 = vadd.f32 %v869_v4, %v349_v53 }
  0x40   : > { %474 = vxpose.xlu1.b32.cont [6/16] %v426_v58, 128  ;;  %v433_v58 = vmax.f32 %v401_v54, 0.0 }
  0x41   : > { %442 = vxpose.xlu0.b32.cont [6/16] %v410_v59, 128  ;;  %v417_v59 = vmax.f32 %v385_v55, 0.0 }
  0x48   : > { %475 = vxpose.xlu1.b32.cont [7/16] %v427_v3, 128  ;;  %v746_v3 = vunpack.c.l.bf16 %v762_v62 }
  0x49   : > { %443 = vxpose.xlu0.b32.cont [7/16] %v411_v5, 128  ;;  %v714_v5 = vunpack.c.l.bf16 %v754_v63 }
  0x4a   : > { %v367_v8 = vmul.f32 %v862_v0, %v746_v3 }
  0x4b   : > { %v351_v9 = vmul.f32 %v862_v0, %v714_v5 }
  0x4c   : > { %v403_v10 = vadd.f32 %v869_v4, %v367_v8 }
  0x4d   : > { %v387_v11 = vadd.f32 %v869_v4, %v351_v9 }
  0x50   : > { %476 = vxpose.xlu1.b32.cont [8/16] %v428_v14, 128  ;;  %v435_v14 = vmax.f32 %v403_v10, 0.0 }
  0x51   : > { %444 = vxpose.xlu0.b32.cont [8/16] %v412_v15, 128  ;;  %v419_v15 = vmax.f32 %v387_v11, 0.0 }
  0x58   : > { %477 = vxpose.xlu1.b32.cont [9/16] %v429_v22, 128 }
  0x59   : > { %445 = vxpose.xlu0.b32.cont [9/16] %v413_v23, 128 }
  0x60   : > { %478 = vxpose.xlu1.b32.cont [10/16] %v430_v32, 128 }
  0x61   : > { %446 = vxpose.xlu0.b32.cont [10/16] %v414_v33, 128 }
  0x68   : > { %479 = vxpose.xlu1.b32.cont [11/16] %v431_v40, 128 }
  0x69   : > { %447 = vxpose.xlu0.b32.cont [11/16] %v415_v41, 128 }
  0x70   : > { %480 = vxpose.xlu1.b32.cont [12/16] %v432_v50, 128 }
  0x71   : > { %448 = vxpose.xlu0.b32.cont [12/16] %v416_v51, 128 }
  0x78   : > { %481 = vxpose.xlu1.b32.cont [13/16] %v433_v58, 128 }
  0x79   : > { %449 = vxpose.xlu0.b32.cont [13/16] %v417_v59, 128 }
  0x80   : > { %482 = vxpose.xlu1.b32.cont [14/16] %v434_v6, 128 }
  0x81   : > { %450 = vxpose.xlu0.b32.cont [14/16] %v418_v7, 128 }
  0x88   : > { %483 = vxpose.xlu1.b32.cont [15/16] %v435_v14, 128 }
  0x89   : > { %451 = vxpose.xlu0.b32.cont [15/16] %v419_v15, 128 }
  0x90   : > { %484 = vxpose.xlu1.b32.end [16/16] %v436_v20, 128 }
  0x91   : > { %452 = vxpose.xlu0.b32.end [16/16] %v420_v21, 128 }
  0xbc   : > { %v485_v0 = vpop.trf.xlu1 }
  0xbd   : > { %v453_v4 = vpop.trf.xlu0  ;;  %502 = vst [vmem:[%s953_s27 + $0x8] sm:$0xff] %v485_v0 }
  0xbe   : > { %501 = vst [vmem:[%s953_s27] sm:$0xff] %v453_v4 }
  0xc4   : > { %v486_v22 = vpop.trf.xlu1 }
  0xc5   : > { %v454_v23 = vpop.trf.xlu0  ;;  %504 = vst [vmem:[%s953_s27 + $0x18] sm:$0xff] %v486_v22 }
  0xc6   : > { %503 = vst [vmem:[%s953_s27 + $0x10] sm:$0xff] %v454_v23 }
  0xcc   : > { %v487_v24 = vpop.trf.xlu1 }
  0xcd   : > { %v455_v25 = vpop.trf.xlu0  ;;  %506 = vst [vmem:[%s953_s27 + $0x28] sm:$0xff] %v487_v24 }
  0xce   : > { %505 = vst [vmem:[%s953_s27 + $0x20] sm:$0xff] %v455_v25 }
  0xd4   : > { %v488_v26 = vpop.trf.xlu1 }
  0xd5   : > { %v456_v27 = vpop.trf.xlu0  ;;  %508 = vst [vmem:[%s953_s27 + $0x38] sm:$0xff] %v488_v26 }
  0xd6   : > { %507 = vst [vmem:[%s953_s27 + $0x30] sm:$0xff] %v456_v27 }
  0xdc   : > { %v489_v28 = vpop.trf.xlu1 }
  0xdd   : > { %v457_v29 = vpop.trf.xlu0  ;;  %510 = vst [vmem:[%s953_s27 + $0x48] sm:$0xff] %v489_v28 }
  0xde   : > { %509 = vst [vmem:[%s953_s27 + $0x40] sm:$0xff] %v457_v29 }
  0xe4   : > { %v490_v30 = vpop.trf.xlu1 }
  0xe5   : > { %v458_v31 = vpop.trf.xlu0  ;;  %512 = vst [vmem:[%s953_s27 + $0x58] sm:$0xff] %v490_v30 }
  0xe6   : > { %511 = vst [vmem:[%s953_s27 + $0x50] sm:$0xff] %v458_v31 }
  0xec   : > { %v491_v32 = vpop.trf.xlu1 }
  0xed   : > { %v459_v33 = vpop.trf.xlu0  ;;  %514 = vst [vmem:[%s953_s27 + $0x68] sm:$0xff] %v491_v32 }
  0xee   : > { %513 = vst [vmem:[%s953_s27 + $0x60] sm:$0xff] %v459_v33 }
  0xf4   : > { %v492_v34 = vpop.trf.xlu1 }
  0xf5   : > { %v460_v35 = vpop.trf.xlu0  ;;  %516 = vst [vmem:[%s953_s27 + $0x78] sm:$0xff] %v492_v34 }
  0xf6   : > { %515 = vst [vmem:[%s953_s27 + $0x70] sm:$0xff] %v460_v35 }
  0xfc   : > { %v493_v36 = vpop.trf.xlu1 }
  0xfd   : > { %v461_v37 = vpop.trf.xlu0  ;;  %518 = vst [vmem:[%s953_s27 + $0x88] sm:$0xff] %v493_v36 }
  0xfe   : > { %517 = vst [vmem:[%s953_s27 + $0x80] sm:$0xff] %v461_v37 }
 0x104   : > { %v494_v38 = vpop.trf.xlu1 }
 0x105   : > { %v462_v39 = vpop.trf.xlu0  ;;  %520 = vst [vmem:[%s953_s27 + $0x98] sm:$0xff] %v494_v38 }
 0x106   : > { %519 = vst [vmem:[%s953_s27 + $0x90] sm:$0xff] %v462_v39 }
 0x10c   : > { %v495_v40 = vpop.trf.xlu1 }
 0x10d   : > { %v463_v41 = vpop.trf.xlu0  ;;  %522 = vst [vmem:[%s953_s27 + $0xa8] sm:$0xff] %v495_v40 }
 0x10e   : > { %521 = vst [vmem:[%s953_s27 + $0xa0] sm:$0xff] %v463_v41 }
 0x114   : > { %v496_v42 = vpop.trf.xlu1 }
 0x115   : > { %v464_v43 = vpop.trf.xlu0  ;;  %524 = vst [vmem:[%s953_s27 + $0xb8] sm:$0xff] %v496_v42 }
 0x116   : > { %523 = vst [vmem:[%s953_s27 + $0xb0] sm:$0xff] %v464_v43 }
 0x11c   : > { %v497_v44 = vpop.trf.xlu1 }
 0x11d   : > { %v465_v45 = vpop.trf.xlu0  ;;  %526 = vst [vmem:[%s953_s27 + $0xc8] sm:$0xff] %v497_v44 }
 0x11e   : > { %525 = vst [vmem:[%s953_s27 + $0xc0] sm:$0xff] %v465_v45 }
 0x124   : > { %v498_v46 = vpop.trf.xlu1 }
 0x125   : > { %v466_v47 = vpop.trf.xlu0  ;;  %528 = vst [vmem:[%s953_s27 + $0xd8] sm:$0xff] %v498_v46 }
 0x126   : > { %527 = vst [vmem:[%s953_s27 + $0xd0] sm:$0xff] %v466_v47 }
 0x12c   : > { %v499_v48 = vpop.trf.xlu1 }
 0x12d   : > { %v467_v49 = vpop.trf.xlu0  ;;  %530 = vst [vmem:[%s953_s27 + $0xe8] sm:$0xff] %v499_v48 }
 0x12e   : > { %529 = vst [vmem:[%s953_s27 + $0xe0] sm:$0xff] %v467_v49 }
 0x134   : > { %v500_v50 = vpop.trf.xlu1 }
 0x135   : > { %v468_v51 = vpop.trf.xlu0  ;;  %532 = vst [vmem:[%s953_s27 + $0xf8] sm:$0xff] %v500_v50 }
 0x136   : > { %531 = vst [vmem:[%s953_s27 + $0xf0] sm:$0xff] %v468_v51 }
 0x137 PF: > { %s13_s14 = sadd.s32 1, %s811_s14   ;;  %s1000_s12 = smov %s807_s13 }
 0x138   : > { %p10_p5 = scmp.ge.s32.totalorder %s13_s14, 4   ;;  %s1001_s13 = smov %s1003_s15 }
 0x13a   :  { %12 = sbr.rel (!%p10_p5) target bundleno = 2 (0x2), region = 68 }

// kernel: conv_block_forward.2
= control target key start
LH: loop header
LB: loop body
LE: loop exit
PB: predicated region body
PF: predicated region fallthrough
CT: control target
= control target key end

     0   :  { %s3465_s15 = smov 0   ;;  %s3467_s16 = smov 0   ;;  %s4724_s0 = inlined_call_operand.vmem [shape: bf16[2,18,18,4], index: 0, kind: input, shape index: {}]   ;;  %s4725_s1 = inlined_call_operand.vmem [shape: bf16[36,128], index: 1, kind: input, shape index: {}]   ;;  %s4726_s2 = inlined_call_operand.vmem [shape: bf16[2,256,128], index: 2, kind: output, shape index: {0}]   ;;  %s4727_s3 = inlined_call_operand.vmem [shape: f32[2,1,1,128], index: 3, kind: output, shape index: {1}]   ;;  %s4728_s4 = inlined_call_operand.vmem [shape: f32[2,1,1,128], index: 4, kind: output, shape index: {2}]  }
   0x1   :  { %s3469_s17 = smov 0  }
   0x2 LB: > { %s34_s18 = sadd.s32 1, %s3426_s16  ;;  %p2842_p0 = scmp.ge.s32.totalorder %s3430_s17, 1  ;;  %s3430_s17 = sphi %s3469_s17, %s15_s17   ;;  %s3426_s16 = sphi %s3467_s16, %s4730_s16   ;;  %s3422_s15 = sphi %s3465_s15, %s4729_s15  }
   0x3   : > { %p36_p1 = scmp.ge.s32.totalorder %s34_s18, 2  ;;  %p207_p2 = scmp.lt.s32.totalorder %s3430_s17, 3 }
   0x5   : > { %s4732_s18 = smov (%p36_p1, %s34_s18), 0  ;;  %p208_p3 = pnand %p2842_p0, %p207_p2 }
   0x6   : > { %p262_p4 = scmp.lt.s32.totalorder (!%p208_p3), %s3422_s15, 1  ;;  %s3432_s23 = smov (!%p208_p3), 12  }
   0x7   : > { %211 = sbr.rel (%p208_p3) target bundleno = 714 (0x2ca), region = 28  ;;  %s3433_s24 = smov (!%p208_p3), 4  }
   0x8   : > { %s3434_s25 = smov (!%p208_p3), 8   ;;  %s3435_s26 = smov (!%p208_p3), 20  }
   0x9   : > { %s3436_s27 = smov (!%p208_p3), 16   ;;  %s3437_s28 = smov (!%p208_p3), 24  }
   0xa   : > { %s3438_s29 = smov (!%p208_p3), 28   ;;  %s3439_s30 = smov (!%p208_p3), 32  }
   0xc   : > { %s4734_s15 = smov (!%p262_p4, %s3422_s15), 1  ;;  %vm635_vm0 = vsmask.f32 7424  ;;  %vm908_vm1 = vcmask 1046528   ;;  %vm2330_vm2 = vcmask 1041408   ;;  %vm2013_vm3 = vcmask 31744  }
   0xd   : > { %s3298_s19 = smul.u32 216, %s4734_s15  ;;  %vm2046_vm4 = vcmask 64512   ;;  %vm2079_vm5 = vcmask 97280   ;;  %vm2112_vm6 = vcmask 130048   ;;  %vm2145_vm7 = vcmask 162816   ;;  %s3000_s11 = sshll.u32 %s4734_s15, 7 }
   0xe   : > { %vm2178_vm8 = vcmask 195584   ;;  %vm2211_vm9 = vcmask 228352   ;;  %vm2244_vm10 = vcmask 261120   ;;  %vm2297_vm11 = vcmask 293888   ;;  %s4250_s14 = scalar_lea.vmem %s4726_s2, %s3000_s11  ;;  %s292_s21 = scalar_lea.vmem %s4727_s3, %s4734_s15 }
   0xf   : > { %s3489_s22 = scalar_lea.vmem %s4724_s0, %s3298_s19 }
  0x10   : > { %v3492_v0 = vld [vmem:[%s3489_s22 + $0xc] sm:$0xff]   ;;  %v3498_v2 = vld [vmem:[%s3489_s22 + $0x18] sm:$0xff]   ;;  %v341_v3 = vld [vmem:[%s3489_s22 + $0x20] sm:$0x1] }
  0x11   : > { %v3495_v1 = vld [vmem:[%s3489_s22 + $0xc] sm:$0xf0]  ;;  %v605_v4 = vunpack.c.l.b16 %v341_v3  ;;  %v661_v5 = vshrl.u32 %v3498_v2, 16  ;;  %v3503_v6 = vld [vmem:[%s3489_s22] sm:$0xff]   ;;  %v339_v7 = vld [vmem:[%s3489_s22 + $0x8] sm:$0x1]  ;;  %1069 = vrot.lane.b32.xlu0 %v3492_v0, %s3432_s23 }
  0x12   : > { %v3507_v8 = vld [vmem:[%s3489_s22 + $0x24] sm:$0xff]   ;;  %v663_v10 = vshll.u32 %v3498_v2, 16  ;;  %v603_v11 = vunpack.c.l.b16 %v339_v7  ;;  %v637_v12 = vshrl.u32 %v3503_v6, 16  ;;  %v639_v13 = vshll.u32 %v3503_v6, 16  ;;  %v342_v14 = vld [vmem:[%s3489_s22 + $0x2c] sm:$0x1] }
  0x13   : > { %v3510_v9 = vld [vmem:[%s3489_s22 + $0x24] sm:$0xf0]  ;;  %v3517_v15 = vld [vmem:[%s3489_s22 + $0xc] sm:$0xff]   ;;  %v3522_v17 = vpack.c.b16 %v605_v4, %v605_v4  ;;  %v606_v21 = vunpack.c.l.b16 %v342_v14  ;;  %v340_v22 = vld [vmem:[%s3489_s22 + $0x14] sm:$0x1]  ;;  %v1152_v23 = vshll.u32 %v3492_v0, 16 }
  0x14   : > { %v3520_v16 = vld [vmem:[%s3489_s22 + $0xc] sm:$0xf0]  ;;  %v665_v18 = vrot.slane %v663_v10, 1  ;;  %v619_v19 = vpack.c.b16 %v603_v11, %v603_v11  ;;  %v641_v20 = vrot.slane %v639_v13, 1  ;;  %v3202_v25 = vld [vmem:[%s3489_s22] sm:$0xf0]  ;;  %v604_v36 = vunpack.c.l.b16 %v340_v22 }
  0x15   : > { %v668_v24 = vshll.u32 %v3522_v17, 16  ;;  %v3203_v26 = vld [vmem:[%s3489_s22] sm:$0xe]  ;;  %v3533_v30 = vpack.c.b16 %v606_v21, %v606_v21  ;;  %v673_v32 = vshrl.u32 %v3507_v8, 16  ;;  %v675_v33 = vshll.u32 %v3507_v8, 16 }
  0x16   : > { %v3531_v27 = vor.u32 %v665_v18, %v661_v5  ;;  %v642_v28 = vor.u32 %v641_v20, %v637_v12  ;;  %v644_v29 = vshll.u32 %v619_v19, 16  ;;  %v3204_v37 = vor.u32 %v3203_v26, %v3202_v25  ;;  %v2878_v38 = vld [vmem:[%s3489_s22 + $0x14] sm:$0x1]  ;;  %v3337_v46 = vld [vmem:[%s3489_s22 + $0xc] sm:$0xe] }
  0x17   : > { %v670_v31 = vrot.slane %v668_v24, 1  ;;  %v680_v35 = vshll.u32 %v3533_v30, 16  ;;  %v677_v40 = vrot.slane %v675_v33, 1  ;;  %v910_v41 = vrot.slane %v619_v19, 1  ;;  %v2942_v51 = vld [vmem:[%s3489_s22 + $0x20] sm:$0x1] }
  0x18   : > { %v646_v34 = vrot.slane %v644_v29, 1  ;;  %v3543_v44 = vpack.c.b16 %v604_v36, %v604_v36  ;;  %v909_v45 = vrot.slane %v3204_v37, 1  ;;  %v649_v48 = vshrl.u32 %v3517_v15, 16  ;;  %v343_v57 = vld [vmem:[%s3489_s22 + $0x38] sm:$0x1]  ;;  %v3558_v5 = vld [vmem:[%s3489_s22 + $0x30] sm:$0xff]  }
  0x19   : > { %v671_v39 = vsel %vm635_vm0, %v3531_v27, %v670_v31  ;;  %v682_v43 = vrot.slane %v680_v35, 1  ;;  %v678_v47 = vor.u32 %v677_v40, %v673_v32  ;;  %v651_v49 = vshll.u32 %v3517_v15, 16  ;;  %v3340_v20 = vld [vmem:[%s3489_s22 + $0xc] sm:$0xe]  ;;  %v3251_v29 = vld [vmem:[%s3489_s22 + $0x18] sm:$0xe] }
  0x1a   : > { %832 = vrot.lane.b32.xlu1 %v671_v39, %s3433_s24  ;;  %v647_v42 = vsel %vm635_vm0, %v642_v28, %v646_v34  ;;  %v1117_v50 = vunpack.c.l.b16 %v2878_v38  ;;  %v656_v52 = vshll.u32 %v3543_v44, 16  ;;  %v911_v53 = vsel %vm908_vm1, %v909_v45, %v910_v41  ;;  %v3250_v28 = vld [vmem:[%s3489_s22 + $0x18] sm:$0xf0]  ;;  %v3208_v35 = vld [vmem:[%s3489_s22 + $0x30] sm:$0xf0] }
  0x1b   : > { %828 = vrot.lane.b32.xlu0 %v647_v42, %s3433_s24  ;;  %v653_v54 = vrot.slane %v651_v49, 1  ;;  %957 = vrot.lane.b32.xlu2 %v911_v53, %s3434_s25  ;;  %v1150_v56 = vshrl.u32 %v3492_v0, 16  ;;  %v683_v58 = vsel %vm635_vm0, %v678_v47, %v682_v43  ;;  %v1154_v60 = vrot.slane %v1152_v23, 1  ;;  %v3209_v36 = vld [vmem:[%s3489_s22 + $0x30] sm:$0xe]  ;;  %v2854_v38 = vld [vmem:[%s3489_s22 + $0x3c] sm:$0xff]  }
  0x1c   : > { %v1133_v55 = vpack.c.b16 %v1117_v50, %v1117_v50  ;;  %v658_v59 = vrot.slane %v656_v52, 1  ;;  %v1629_v61 = vunpack.c.l.b16 %v2942_v51  ;;  %v3338_v3 = vor.u32 %v3337_v46, %v3495_v1  ;;  %v2879_v37 = vld [vmem:[%s3489_s22 + $0x20] sm:$0x1]  ;;  %v2882_v47 = vld [vmem:[%s3489_s22 + $0x44] sm:$0x1] }
  0x1d   : > { %v654_v62 = vor.u32 %v653_v54, %v649_v48  ;;  %v607_v7 = vunpack.c.l.b16 %v343_v57  ;;  %v685_v12 = vshrl.u32 %v3558_v5, 16  ;;  %v687_v13 = vshll.u32 %v3558_v5, 16  ;;  %v3342_v39 = vld [vmem:[%s3489_s22 + $0x3c] sm:$0xf0]  ;;  %v3227_v57 = vld [vmem:[%s3489_s22 + $0x18] sm:$0xe] }
  0x1e   : > { %v1157_v63 = vshll.u32 %v1133_v55, 16  ;;  %v1422_v4 = vrot.slane %v1133_v55, 1  ;;  %v1421_v10 = vrot.slane %v3338_v3, 1  ;;  %v1155_v14 = vor.u32 %v1154_v60, %v1150_v56  ;;  %v3226_v56 = vld [vmem:[%s3489_s22 + $0x18] sm:$0xf0]  ;;  %v2912_v60 = vld [vmem:[%s3489_s22 + $0x24] sm:$0xff]  }
  0x1f   : > { %v659_v0 = vsel %vm635_vm0, %v654_v62, %v658_v59  ;;  %v623_v11 = vpack.c.b16 %v607_v7, %v607_v7  ;;  %v1645_v19 = vpack.c.b16 %v1629_v61, %v1629_v61  ;;  %v689_v21 = vrot.slane %v687_v13, 1  ;;  %v3345_v61 = vld [vmem:[%s3489_s22 + $0x24] sm:$0xf0] }
  0x20   : > { %v1159_v18 = vrot.slane %v1157_v63, 1  ;;  %v1423_v1 = vsel %vm908_vm1, %v1421_v10, %v1422_v4  ;;  %v3341_v31 = vor.u32 %v3340_v20, %v3520_v16  ;;  %v3252_v33 = vor.u32 %v3251_v29, %v3250_v28  ;;  %v2943_v10 = vld [vmem:[%s3489_s22 + $0x2c] sm:$0x1] }
  0x21   : > { %v692_v22 = vshll.u32 %v623_v11, 16  ;;  %v3568_v23 = vor.u32 %v689_v21, %v685_v12  ;;  %v1669_v26 = vshll.u32 %v1645_v19, 16  ;;  %v913_v16 = vrot.slane %v3543_v44, 1 }
  0x22   : > { %834 = vrot.lane.b32.xlu1 %v683_v58, %s3433_s24  ;;  %v1160_v25 = vsel %vm635_vm0, %v1155_v14, %v1159_v18  ;;  %v912_v40 = vrot.slane %v3341_v31, 1  ;;  %v1933_v41 = vrot.slane %v3252_v33, 1  ;;  %v1934_v42 = vrot.slane %v1645_v19, 1  ;;  %v3343_v58 = vld [vmem:[%s3489_s22 + $0x3c] sm:$0xe] }
  0x23   : > { %830 = vrot.lane.b32.xlu0 %v659_v0, %s3433_s24  ;;  %1469 = vrot.lane.b32.xlu2 %v1423_v1, %s3435_s26  ;;  %v694_v24 = vrot.slane %v692_v22, 1  ;;  %v1671_v34 = vrot.slane %v1669_v26, 1  ;;  %v3210_v45 = vor.u32 %v3209_v36, %v3208_v35  ;;  %v1118_v46 = vunpack.c.l.b16 %v2879_v37  ;;  %v2946_v19 = vld [vmem:[%s3489_s22 + $0x50] sm:$0x1]  ;;  %v3346_v26 = vld [vmem:[%s3489_s22 + $0x24] sm:$0xe] }
  0x24   : > { %v914_v48 = vsel %vm908_vm1, %v912_v40, %v913_v16  ;;  %v1935_v49 = vsel %vm908_vm1, %v1933_v41, %v1934_v42  ;;  %v922_v50 = vrot.slane %v623_v11, 1  ;;  %v1121_v52 = vunpack.c.l.b16 %v2882_v47  ;;  %v347_v36 = vld [vmem:[%s3489_s22 + $0x68] sm:$0x1]  ;;  %v3623_v16 = vld [vmem:[%s3489_s22 + $0x60] sm:$0xff]  }
  0x25   : > { %v695_v32 = vsel %vm635_vm0, %v3568_v23, %v694_v24  ;;  %v1672_v43 = vsel %vm635_vm0, %v3531_v27, %v1671_v34  ;;  %v921_v44 = vrot.slane %v3210_v45, 1  ;;  %v1134_v51 = vpack.c.b16 %v1118_v46, %v1118_v46  ;;  %v3256_v45 = vld [vmem:[%s3489_s22 + $0x48] sm:$0xf0]  ;;  %v3257_v46 = vld [vmem:[%s3489_s22 + $0x48] sm:$0xe] }
  0x26   : > { %v1200_v53 = vshll.u32 %v2854_v38, 16  ;;  %v1137_v59 = vpack.c.b16 %v1121_v52, %v1121_v52  ;;  %v3228_v62 = vor.u32 %v3227_v57, %v3226_v56  ;;  %v1198_v63 = vshrl.u32 %v2854_v38, 16  ;;  %v3214_v47 = vld [vmem:[%s3489_s22 + $0x60] sm:$0xf0] }
  0x27   : > { %v923_v54 = vsel %vm908_vm1, %v921_v44, %v922_v50  ;;  %v1169_v55 = vshll.u32 %v1134_v51, 16  ;;  %v1425_v11 = vrot.slane %v1134_v51, 1  ;;  %v3344_v18 = vor.u32 %v3343_v58, %v3342_v39  ;;  %v3348_v44 = vld [vmem:[%s3489_s22 + $0x6c] sm:$0xf0] }
  0x28   : > { %v1202_v3 = vrot.slane %v1200_v53, 1  ;;  %v1205_v4 = vshll.u32 %v1137_v59, 16  ;;  %v1424_v0 = vrot.slane %v3228_v62, 1  ;;  %v1630_v1 = vunpack.c.l.b16 %v2943_v10 }
  0x29   : > { %v1171_v7 = vrot.slane %v1169_v55, 1  ;;  %v1434_v22 = vrot.slane %v1137_v59, 1  ;;  %v1633_v28 = vunpack.c.l.b16 %v2946_v19  ;;  %v3347_v39 = vor.u32 %v3346_v26, %v3345_v61  ;;  %v2886_v59 = vld [vmem:[%s3489_s22 + $0x74] sm:$0x1] }
  0x2a   : > { %1341 = vrot.lane.b32.xlu1 %v1160_v25, %s3436_s27  ;;  %v1203_v12 = vor.u32 %v1202_v3, %v1198_v63  ;;  %v1207_v13 = vrot.slane %v1205_v4, 1  ;;  %v1426_v20 = vsel %vm908_vm1, %v1424_v0, %v1425_v11  ;;  %v1646_v24 = vpack.c.b16 %v1630_v1, %v1630_v1  ;;  %v3349_v4 = vld [vmem:[%s3489_s22 + $0x6c] sm:$0xe]  ;;  %v3646_v0 = vld [vmem:[%s3489_s22 + $0x3c] sm:$0xff]  }
  0x2b   : > { %1581 = vrot.lane.b32.xlu0 %v3498_v2, %s3437_s28  ;;  %836 = vrot.lane.b32.xlu2 %v695_v32, %s3433_s24  ;;  %v1172_v14 = vsel %vm635_vm0, %v3531_v27, %v1171_v7  ;;  %v1676_v25 = vshll.u32 %v2912_v60, 16  ;;  %v3614_v27 = vld [vmem:[%s3489_s22 + $0x48] sm:$0xff]   ;;  %v1674_v32 = vshrl.u32 %v2912_v60, 16  ;;  %v1649_v35 = vpack.c.b16 %v1633_v28, %v1633_v28  ;;  %v3649_v11 = vld [vmem:[%s3489_s22 + $0x3c] sm:$0xf0] }
  0x2c   : > { %v1208_v21 = vsel %vm635_vm0, %v1203_v12, %v1207_v13  ;;  %v1712_v29 = vshll.u32 %v3614_v27, 16  ;;  %v1681_v34 = vshll.u32 %v1646_v24, 16  ;;  %v1710_v37 = vshrl.u32 %v3614_v27, 16 }
  0x2d   : > { %v1678_v33 = vrot.slane %v1676_v25, 1  ;;  %v1717_v40 = vshll.u32 %v1649_v35, 16  ;;  %v735_v50 = vshll.u32 %v3623_v16, 16  ;;  %v1936_v52 = vrot.slane %v3347_v39, 1 }
  0x2e   : > { %v1683_v42 = vrot.slane %v1681_v34, 1  ;;  %v1937_v53 = vrot.slane %v1646_v24, 1  ;;  %v3258_v56 = vor.u32 %v3257_v46, %v3256_v45  ;;  %v1946_v10 = vrot.slane %v1649_v35, 1 }
  0x2f   : > { %v1679_v41 = vor.u32 %v1678_v33, %v1674_v32  ;;  %v737_v61 = vrot.slane %v735_v50, 1  ;;  %v3350_v25 = vor.u32 %v3349_v4, %v3348_v44  ;;  %v697_v44 = vshrl.u32 %v3646_v0, 16 }
  0x30   : > { %v1938_v63 = vsel %vm908_vm1, %v1936_v52, %v1937_v53  ;;  %v1945_v7 = vrot.slane %v3258_v56, 1  ;;  %v2850_v53 = vld [vmem:[%s3489_s22 + $0x24] sm:$0xff]   ;;  %v3205_v56 = vld [vmem:[%s3489_s22 + $0x18] sm:$0xf0] }
  0x31   : > { %v1684_v55 = vsel %vm635_vm0, %v1679_v41, %v1683_v42  ;;  %v1445_v35 = vrot.slane %v3350_v25, 1  ;;  %v699_v42 = vshll.u32 %v3646_v0, 16 }
  0x32   : > { %1853 = vrot.lane.b32.xlu1 %v1672_v43, %s3438_s29  ;;  %v611_v43 = vunpack.c.l.b16 %v347_v36 }
  0x33   : > { %959 = vrot.lane.b32.xlu0 %v914_v48, %s3434_s25  ;;  %1981 = vrot.lane.b32.xlu2 %v1935_v49, %s3439_s30  ;;  %v3215_v48 = vld [vmem:[%s3489_s22 + $0x60] sm:$0xe]  ;;  %v2862_v49 = vld [vmem:[%s3489_s22 + $0x6c] sm:$0xff]   ;;  %v701_v50 = vrot.slane %v699_v42, 1 }
  0x34   : > { %v627_v57 = vpack.c.b16 %v611_v43, %v611_v43  ;;  %v3216_v58 = vor.u32 %v3215_v48, %v3214_v47  ;;  %v1248_v19 = vshll.u32 %v2862_v49, 16 }
  0x36   : > { %v740_v62 = vshll.u32 %v627_v57, 16  ;;  %v933_v12 = vrot.slane %v3216_v58, 1  ;;  %v934_v13 = vrot.slane %v627_v57, 1  ;;  %v1250_v32 = vrot.slane %v1248_v19, 1  ;;  %v3206_v57 = vld [vmem:[%s3489_s22 + $0x18] sm:$0xe] }
  0x37   : > { %v2883_v19 = vld [vmem:[%s3489_s22 + $0x50] sm:$0x1] }
  0x38   : > { %v742_v1 = vrot.slane %v740_v62, 1 }
  0x3a   : > { %965 = vrot.lane.b32.xlu1 %v923_v54, %s3434_s25  ;;  %v1719_v54 = vrot.slane %v1717_v40, 1 }
  0x3b   : > { %1077 = vrot.lane.b32.xlu0 %v2854_v38, %s3432_s23  ;;  %1071 = vrot.lane.b32.xlu2 %v3498_v2, %s3432_s23  ;;  %v1433_v2 = vrot.slane %v3344_v18, 1  ;;  %v1714_v38 = vrot.slane %v1712_v29, 1  ;;  %v1246_v29 = vshrl.u32 %v2862_v49, 16 }
  0x3d   : > { %v1435_v31 = vsel %vm908_vm1, %v1433_v2, %v1434_v22  ;;  %v3635_v51 = vor.u32 %v1714_v38, %v1710_v37  ;;  %v344_v2 = vld [vmem:[%s3489_s22 + $0x44] sm:$0x1]  ;;  %v935_v22 = vsel %vm908_vm1, %v933_v12, %v934_v13  ;;  %v1251_v39 = vor.u32 %v1250_v32, %v1246_v29 }
  0x3e   : > { %v608_v34 = vunpack.c.l.b16 %v344_v2  ;;  %v1174_v29 = vshrl.u32 %v2850_v53, 16 }
  0x3f   : > { %v1720_v3 = vsel %vm635_vm0, %v3635_v51, %v1719_v54  ;;  %v3676_v54 = vld [vmem:[%s3489_s22 + $0x24] sm:$0xf0] }
  0x40   : > { %v624_v41 = vpack.c.b16 %v608_v34, %v608_v34 }
  0x42   : > { %1343 = vrot.lane.b32.xlu1 %v1172_v14, %s3436_s27  ;;  %v1125_v14 = vunpack.c.l.b16 %v2886_v59  ;;  %v704_v52 = vshll.u32 %v624_v41, 16  ;;  %v925_v25 = vrot.slane %v624_v41, 1 }
  0x43   : > { %1471 = vrot.lane.b32.xlu0 %v1426_v20, %s3435_s26  ;;  %1349 = vrot.lane.b32.xlu2 %v1208_v21, %s3436_s27  ;;  %v2950_v20 = vld [vmem:[%s3489_s22 + $0x80] sm:$0x1]  ;;  %v1947_v21 = vsel %vm908_vm1, %v1945_v7, %v1946_v10 }
  0x44   : > { %v1141_v24 = vpack.c.b16 %v1125_v14, %v1125_v14  ;;  %v1637_v28 = vunpack.c.l.b16 %v2950_v20  ;;  %v706_v62 = vrot.slane %v704_v52, 1 }
  0x46   : > { %v1253_v33 = vshll.u32 %v1141_v24, 16  ;;  %v1446_v36 = vrot.slane %v1141_v24, 1  ;;  %v1653_v38 = vpack.c.b16 %v1637_v28, %v1637_v28 }
  0x48   : > { %v1255_v40 = vrot.slane %v1253_v33, 1  ;;  %v1447_v43 = vsel %vm908_vm1, %v1445_v35, %v1446_v36  ;;  %v1765_v47 = vshll.u32 %v1653_v38, 16  ;;  %v1958_v2 = vrot.slane %v1653_v38, 1  ;;  %v3355_v35 = vld [vmem:[%s3489_s22 + $0x24] sm:$0xe] }
  0x49   : > { %v3232_v38 = vld [vmem:[%s3489_s22 + $0x48] sm:$0xf0] }
  0x4a   : > { %1477 = vrot.lane.b32.xlu1 %v1435_v31, %s3435_s26  ;;  %v3663_v31 = vld [vmem:[%s3489_s22 + $0x78] sm:$0xff]   ;;  %v1256_v48 = vsel %vm635_vm0, %v1251_v39, %v1255_v40  ;;  %v1767_v59 = vrot.slane %v1765_v47, 1  ;;  %v3233_v39 = vld [vmem:[%s3489_s22 + $0x48] sm:$0xe]  ;;  %v2281_v40 = vld [vmem:[%s4725_s1 + $0x10] sm:$0x3] }
  0x4b   : > { %1589 = vrot.lane.b32.xlu0 %v3614_v27, %s3437_s28  ;;  %1583 = vrot.lane.b32.xlu2 %v2912_v60, %s3437_s28  ;;  %v733_v60 = vshrl.u32 %v3623_v16, 16  ;;  %v1760_v37 = vshll.u32 %v3663_v31, 16  ;;  %v1758_v45 = vshrl.u32 %v3663_v31, 16  ;;  %v3720_v47 = vld [vmem:[%s3489_s22 + $0x54] sm:$0xf0] }
  0x4d   : > { %v3653_v18 = vor.u32 %v737_v61, %v733_v60  ;;  %v1762_v46 = vrot.slane %v1760_v37, 1  ;;  %v3263_v60 = vld [vmem:[%s3489_s22 + $0x78] sm:$0xe]  ;;  %v702_v61 = vor.u32 %v701_v50, %v697_v44 }
  0x4f   : > { %v743_v26 = vsel %vm635_vm0, %v3653_v18, %v742_v1  ;;  %v3682_v58 = vor.u32 %v1762_v46, %v1758_v45  ;;  %v707_v12 = vsel %vm635_vm0, %v702_v61, %v706_v62  ;;  %v916_v1 = vrot.slane %v3522_v17, 1  ;;  %v3717_v46 = vld [vmem:[%s3489_s22 + $0x54] sm:$0xff]  }
  0x50   : > { %v2291_v45 = vunpack.c.l.b16 %v2281_v40 }
  0x51   : > { %v1768_v10 = vsel %vm635_vm0, %v3682_v58, %v1767_v59  ;;  %v2947_v59 = vld [vmem:[%s3489_s22 + $0x5c] sm:$0x1] }
  0x52   : > { %1855 = vrot.lane.b32.xlu1 %v1684_v55, %s3438_s29  ;;  %v3352_v55 = vld [vmem:[%s3489_s22 + $0x3c] sm:$0xe]  ;;  %v2294_v44 = vpack.c.b16 %v2291_v45, %v2291_v45 }
  0x53   : > { %1983 = vrot.lane.b32.xlu0 %v1938_v63, %s3439_s30  ;;  %1861 = vrot.lane.b32.xlu2 %v1720_v3, %s3438_s29  ;;  %v2880_v63 = vld [vmem:[%s3489_s22 + $0x2c] sm:$0x1]  ;;  %v3207_v3 = vor.u32 %v3206_v57, %v3205_v56  ;;  %v3353_v13 = vor.u32 %v3352_v55, %v3649_v11  ;;  %v3356_v55 = vor.u32 %v3355_v35, %v3676_v54  ;;  %v351_v35 = vld [vmem:[%s3489_s22 + $0x98] sm:$0x1] }
  0x54   : > { %v1119_v7 = vunpack.c.l.b16 %v2880_v63  ;;  %v2332_v57 = vsel %vm2330_vm2, %v2294_v44, 0  ;;  %v3733_v54 = vld [vmem:[%s3489_s22 + $0x6c] sm:$0xff]  }
  0x55   : > { %v915_v14 = vrot.slane %v3207_v3, 1  ;;  %v924_v24 = vrot.slane %v3353_v13, 1  ;;  %2339 = vmatpush.bf16.msra.mxu0 %v2332_v57  ;;  %3289 = vmatpush.bf16.msra.mxu1 %v2332_v57  ;;  %v1427_v61 = vrot.slane %v3356_v55, 1  ;;  %v3736_v63 = vld [vmem:[%s3489_s22 + $0x6c] sm:$0xf0]  ;;  %v3002_v3 = vld [vmem:[%s4725_s1 + $0x8] sm:$0xff] }
  0x56   : > { %3290 = vmatpush.bf16.msra.mxu2 %v2332_v57  ;;  %3291 = vmatpush.bf16.msra.mxu3 %v2332_v57  ;;  %v745_v44 = vshrl.u32 %v3733_v54, 16 }
  0x57   : > { %v917_v11 = vsel %vm908_vm1, %v915_v14, %v916_v1  ;;  %v926_v33 = vsel %vm908_vm1, %v924_v24, %v925_v25  ;;  %v348_v1 = vld [vmem:[%s3489_s22 + $0x74] sm:$0x1]  ;;  %v1722_v24 = vshrl.u32 %v3717_v46, 16 }
  0x59   : > { %2340 = vmatpush.bf16.msra.mxu0 %v3002_v3  ;;  %3292 = vmatpush.bf16.msra.mxu1 %v3002_v3 }
  0x5a   : > { %1989 = vrot.lane.b32.xlu1 %v1947_v21, %s3439_s30  ;;  %v3698_v21 = vpack.c.b16 %v1119_v7, %v1119_v7  ;;  %v1634_v7 = vunpack.c.l.b16 %v2947_v59  ;;  %3293 = vmatpush.bf16.msra.mxu2 %v3002_v3 }
  0x5b   : > { %973 = vrot.lane.b32.xlu0 %v935_v22, %s3434_s25  ;;  %844 = vrot.lane.b32.xlu2 %v743_v26, %s3433_s24  ;;  %v1176_v22 = vshll.u32 %v2850_v53, 16  ;;  %v1122_v26 = vunpack.c.l.b16 %v2883_v19  ;;  %v3001_v19 = vld [vmem:[%s4725_s1] sm:$0xff] }
  0x5c   : > { %v1181_v17 = vshll.u32 %v3698_v21, 16  ;;  %v1428_v62 = vrot.slane %v3698_v21, 1  ;;  %v1724_v21 = vshll.u32 %v3717_v46, 16  ;;  %3294 = vmatpush.bf16.msra.mxu3 %v3002_v3 }
  0x5d   : > { %v1178_v32 = vrot.slane %v1176_v22, 1  ;;  %v1138_v34 = vpack.c.b16 %v1122_v26, %v1122_v26  ;;  %2341 = vmatpush.bf16.msra.mxu0 %v3001_v19  ;;  %3295 = vmatpush.bf16.msra.mxu1 %v3001_v19 }
  0x5e   : > { %v1183_v36 = vrot.slane %v1181_v17, 1  ;;  %v1429_v14 = vsel %vm908_vm1, %v1427_v61, %v1428_v62  ;;  %3296 = vmatpush.bf16.msra.mxu2 %v3001_v19  ;;  %v1726_v26 = vrot.slane %v1724_v21, 1 }
  0x5f   : > { %v1179_v37 = vor.u32 %v1178_v32, %v1174_v29  ;;  %v1217_v42 = vshll.u32 %v1138_v34, 16  ;;  %v3254_v29 = vld [vmem:[%s3489_s22 + $0x30] sm:$0xe] }
  0x60   : > { %3297 = vmatpush.bf16.msra.mxu3 %v3001_v19  ;;  %v3799_v19 = vld [vmem:[%s3489_s22 + $0x9c] sm:$0xf0] }
  0x61   : > { %v1184_v50 = vsel %vm635_vm0, %v1179_v37, %v1183_v36  ;;  %v1219_v56 = vrot.slane %v1217_v42, 1  ;;  %v3361_v37 = vld [vmem:[%s3489_s22 + $0x6c] sm:$0xe]  ;;  %v3773_v42 = vld [vmem:[%s3489_s22 + $0x90] sm:$0xff]  }
  0x62   : > { %1085 = vrot.lane.b32.xlu1 %v2862_v49, %s3432_s23  ;;  %v3262_v49 = vld [vmem:[%s3489_s22 + $0x78] sm:$0xf0]  ;;  %v3362_v3 = vor.u32 %v3361_v37, %v3736_v63 }
  0x63   : > { %1485 = vrot.lane.b32.xlu0 %v1447_v43, %s3435_s26  ;;  %1357 = vrot.lane.b32.xlu2 %v1256_v48, %s3436_s27  ;;  %v3264_v4 = vor.u32 %v3263_v60, %v3262_v49  ;;  %v2944_v43 = vld [vmem:[%s3489_s22 + $0x38] sm:$0x1]  ;;  %v3234_v48 = vor.u32 %v3233_v39, %v3232_v38  ;;  %v1727_v39 = vor.u32 %v1726_v26, %v1722_v24 }
  0x64   : > { %v1631_v52 = vunpack.c.l.b16 %v2944_v43  ;;  %v936_v21 = vrot.slane %v3362_v3, 1  ;;  %v2928_v3 = vld [vmem:[%s3489_s22 + $0x84] sm:$0xff]  }
  0x65   : > { %v1957_v20 = vrot.slane %v3264_v4, 1  ;;  %v1436_v49 = vrot.slane %v3234_v48, 1  ;;  %v615_v48 = vunpack.c.l.b16 %v351_v35 }
  0x66   : > { %v3729_v60 = vpack.c.b16 %v1631_v52, %v1631_v52 }
  0x67   : > { %v1959_v28 = vsel %vm908_vm1, %v1957_v20, %v1958_v2  ;;  %v1650_v20 = vpack.c.b16 %v1634_v7, %v1634_v7  ;;  %v612_v2 = vunpack.c.l.b16 %v348_v1  ;;  %v3796_v1 = vld [vmem:[%s3489_s22 + $0x9c] sm:$0xff]  }
  0x68   : > { %v1693_v13 = vshll.u32 %v3729_v60, 16  ;;  %v1940_v55 = vrot.slane %v3729_v60, 1 }
  0x69   : > { %v1729_v17 = vshll.u32 %v1650_v20, 16 }
  0x6a   : > { %1597 = vrot.lane.b32.xlu1 %v3663_v31, %s3437_s28  ;;  %v1695_v22 = vrot.slane %v1693_v13, 1  ;;  %v3221_v13 = vld [vmem:[%s3489_s22 + $0x90] sm:$0xe] }
  0x6b   : > { %1869 = vrot.lane.b32.xlu0 %v1768_v10, %s3438_s29  ;;  %838 = vrot.lane.b32.xlu2 %v707_v12, %s3433_s24  ;;  %v3358_v10 = vld [vmem:[%s3489_s22 + $0x54] sm:$0xe]  ;;  %v1731_v40 = vrot.slane %v1729_v17, 1 }
  0x6c   : > { %v3359_v32 = vor.u32 %v3358_v10, %v3720_v47  ;;  %v1696_v36 = vsel %vm635_vm0, %v3568_v23, %v1695_v22  ;;  %v1949_v47 = vrot.slane %v1650_v20, 1  ;;  %v2887_v20 = vld [vmem:[%s3489_s22 + $0x80] sm:$0x1] }
  0x6d   : > { %v1732_v59 = vsel %vm635_vm0, %v1727_v39, %v1731_v40 }
  0x6e   : > { %v1948_v45 = vrot.slane %v3359_v32, 1  ;;  %v1126_v32 = vunpack.c.l.b16 %v2887_v20 }
  0x72   : > { %961 = vrot.lane.b32.xlu1 %v917_v11, %s3434_s25 }
  0x73   : > { %1997 = vrot.lane.b32.xlu0 %v1959_v28, %s3439_s30  ;;  %967 = vrot.lane.b32.xlu2 %v926_v33, %s3434_s25  ;;  %v3253_v28 = vld [vmem:[%s3489_s22 + $0x30] sm:$0xf0]  ;;  %v628_v33 = vpack.c.b16 %v612_v2, %v612_v2 }
  0x74   : > { %v3255_v38 = vor.u32 %v3254_v29, %v3253_v28 }
  0x75   : > { %v3713_v41 = vpop.permute.xlu2 %957  ;;  %v752_v23 = vshll.u32 %v628_v33, 16  ;;  %v937_v2 = vrot.slane %v628_v33, 1 }
  0x76   : > { %v1939_v52 = vrot.slane %v3255_v38, 1  ;;  %v1142_v38 = vpack.c.b16 %v1126_v32, %v1126_v32  ;;  %v2954_v32 = vld [vmem:[%s3489_s22 + $0xb0] sm:$0x1] }
  0x77   : > { %v754_v62 = vrot.slane %v752_v23, 1  ;;  %v938_v33 = vsel %vm908_vm1, %v936_v21, %v937_v2 }
  0x78   : > { %v1941_v60 = vsel %vm908_vm1, %v1939_v52, %v1940_v55  ;;  %v1265_v55 = vshll.u32 %v1142_v38, 16 }
  0x7a   : > { %1073 = vrot.lane.b32.xlu1 %v2850_v53, %s3432_s23  ;;  %v1437_v53 = vrot.slane %v1138_v34, 1  ;;  %v747_v34 = vshll.u32 %v3733_v54, 16 }
  0x7b   : > { %1345 = vrot.lane.b32.xlu0 %v1184_v50, %s3436_s27  ;;  %1079 = vrot.lane.b32.xlu2 %v3614_v27, %s3432_s23  ;;  %v1220_v27 = vsel %vm635_vm0, %v3635_v51, %v1219_v56  ;;  %v783_v56 = vshll.u32 %v3773_v42, 16 }
  0x7c   : > { %v1438_v12 = vsel %vm908_vm1, %v1436_v49, %v1437_v53  ;;  %v749_v50 = vrot.slane %v747_v34, 1  ;;  %v1950_v53 = vsel %vm908_vm1, %v1948_v45, %v1949_v47  ;;  %v2890_v34 = vld [vmem:[%s3489_s22 + $0xa4] sm:$0x1] }
  0x7d   : > { %v3743_v4 = vpop.permute.xlu2 %1469  ;;  %v785_v7 = vrot.slane %v783_v56, 1  ;;  %v1129_v40 = vunpack.c.l.b16 %v2890_v34  ;;  %v2951_v34 = vld [vmem:[%s3489_s22 + $0x8c] sm:$0x1] }
  0x7e   : > { %v750_v61 = vor.u32 %v749_v50, %v745_v44  ;;  %v3239_v44 = vld [vmem:[%s3489_s22 + $0x78] sm:$0xe] }
  0x7f   : > { %v1145_v56 = vpack.c.b16 %v1129_v40, %v1129_v40  ;;  %v1772_v40 = vshll.u32 %v2928_v3, 16 }
  0x80   : > { %v755_v63 = vsel %vm635_vm0, %v750_v61, %v754_v62  ;;  %v1267_v62 = vrot.slane %v1265_v55, 1 }
  0x81   : > { %v1301_v61 = vshll.u32 %v1145_v56, 16 }
  0x82   : > { %1351 = vrot.lane.b32.xlu1 %v1220_v27, %s3436_s27  ;;  %v781_v27 = vshrl.u32 %v3773_v42, 16 }
  0x83   : > { %1479 = vrot.lane.b32.xlu0 %v1438_v12, %s3435_s26  ;;  %1473 = vrot.lane.b32.xlu2 %v1429_v14, %s3435_s26  ;;  %v3758_v25 = vpop.permute.xlu0 %1069  ;;  %v3220_v12 = vld [vmem:[%s3489_s22 + $0x90] sm:$0xf0]  ;;  %v1303_v21 = vrot.slane %v1301_v61, 1 }
  0x84   : > { %v3222_v22 = vor.u32 %v3221_v13, %v3220_v12  ;;  %v3805_v24 = vor.u32 %v785_v7, %v781_v27  ;;  %v1449_v13 = vrot.slane %v1142_v38, 1 }
  0x85   : > { %v3760_v11 = vpop.permute.xlu2 %836 }
  0x8a   : > { %1585 = vrot.lane.b32.xlu1 %v3558_v5, %s3437_s28 }
  0x8b   : > { %1857 = vrot.lane.b32.xlu0 %v1696_v36, %s3438_s29  ;;  %1591 = vrot.lane.b32.xlu2 %v3717_v46, %s3437_s28  ;;  %v631_v46 = vpack.c.b16 %v615_v48, %v615_v48  ;;  %v945_v36 = vrot.slane %v3222_v22, 1  ;;  %v3238_v48 = vld [vmem:[%s3489_s22 + $0x78] sm:$0xf0]  ;;  %v1268_v22 = vsel %vm635_vm0, %v3682_v58, %v1267_v62  ;;  %v1458_v58 = vrot.slane %v1145_v56, 1  ;;  %v3370_v56 = vld [vmem:[%s3489_s22 + $0x84] sm:$0xe] }
  0x8c   : > { %v3775_v43 = vpop.permute.xlu1 %832 }
  0x8d   : > { %v829_v57 = vpop.permute.xlu0 %828  ;;  %v3784_v49 = vpop.permute.xlu2 %1981  ;;  %v788_v10 = vshll.u32 %v631_v46, 16  ;;  %v946_v37 = vrot.slane %v631_v46, 1  ;;  %v1294_v46 = vshrl.u32 %v3796_v1, 16 }
  0x8e   : > { %v2015_v17 = vsel %vm2013_vm3, %v3503_v6, %v829_v57 }
  0x8f   : > { %v790_v26 = vrot.slane %v788_v10, 1  ;;  %v2048_v35 = vsel %vm2046_vm4, %v2015_v17, %v3713_v41  ;;  %v1296_v41 = vshll.u32 %v3796_v1, 16  ;;  %v947_v23 = vsel %vm908_vm1, %v945_v36, %v946_v37  ;;  %v345_v10 = vld [vmem:[%s3489_s22 + $0x50] sm:$0x1] }
  0x90   : > { %v2081_v45 = vsel %vm2079_vm5, %v2048_v35, %v3758_v25  ;;  %v3364_v25 = vld [vmem:[%s3489_s22 + $0x9c] sm:$0xe]  ;;  %v609_v17 = vunpack.c.l.b16 %v345_v10 }
  0x91   : > { %v791_v6 = vsel %vm635_vm0, %v3805_v24, %v790_v26 }
  0x92   : > { %1863 = vrot.lane.b32.xlu1 %v1732_v59, %s3438_s29  ;;  %v3240_v59 = vor.u32 %v3239_v44, %v3238_v48  ;;  %v3865_v37 = vpack.c.b16 %v609_v17, %v609_v17 }
  0x93   : > { %1991 = vrot.lane.b32.xlu0 %v1950_v53, %s3439_s30  ;;  %1985 = vrot.lane.b32.xlu2 %v1941_v60, %s3439_s30  ;;  %v1298_v53 = vrot.slane %v1296_v41, 1  ;;  %v3838_v60 = vld [vmem:[%s3489_s22 + $0x84] sm:$0xf0] }
  0x94   : > { %v3793_v14 = vpop.permute.xlu1 %834  ;;  %v1448_v12 = vrot.slane %v3240_v59, 1  ;;  %v716_v44 = vshll.u32 %v3865_v37, 16  ;;  %v1774_v59 = vrot.slane %v1772_v40, 1 }
  0x95   : > { %v3809_v28 = vpop.permute.xlu0 %830  ;;  %v3811_v29 = vpop.permute.xlu2 %1071  ;;  %v1299_v20 = vor.u32 %v1298_v53, %v1294_v46 }
  0x96   : > { %v718_v53 = vrot.slane %v716_v44, 1 }
  0x97   : > { %v1304_v35 = vsel %vm635_vm0, %v1299_v20, %v1303_v21  ;;  %v3212_v21 = vld [vmem:[%s3489_s22 + $0x48] sm:$0xe] }
  0x9a   : > { %846 = vrot.lane.b32.xlu1 %v755_v63, %s3433_s24 }
  0x9b   : > { %975 = vrot.lane.b32.xlu0 %v938_v33, %s3434_s25  ;;  %852 = vrot.lane.b32.xlu2 %v791_v6, %s3433_s24  ;;  %v1641_v33 = vunpack.c.l.b16 %v2954_v32  ;;  %v1638_v6 = vunpack.c.l.b16 %v2951_v34  ;;  %v3268_v34 = vld [vmem:[%s3489_s22 + $0xa8] sm:$0xf0] }
  0x9c   : > { %v1342_v39 = vpop.permute.xlu1 %1341 }
  0x9d   : > { %v2114_v47 = vsel %vm2112_vm6, %v2081_v45, %v1342_v39  ;;  %v1582_v50 = vpop.permute.xlu0 %1581  ;;  %v3829_v52 = vpop.permute.xlu2 %1349  ;;  %v3872_v39 = vpack.c.b16 %v1641_v33, %v1641_v33  ;;  %v1654_v45 = vpack.c.b16 %v1638_v6, %v1638_v6 }
  0x9e   : > { %v2147_v57 = vsel %vm2145_vm7, %v2114_v47, %v3743_v4 }
  0x9f   : > { %v2180_v27 = vsel %vm2178_vm8, %v2147_v57, %v1582_v50  ;;  %v3367_v50 = vld [vmem:[%s3489_s22 + $0x24] sm:$0xe]  ;;  %v1770_v57 = vshrl.u32 %v2928_v3, 16  ;;  %v1777_v46 = vshll.u32 %v1654_v45, 16  ;;  %v1961_v6 = vrot.slane %v1654_v45, 1 }
  0xa0   : > { %v3368_v20 = vor.u32 %v3367_v50, %v3510_v9  ;;  %v3187_v50 = vld [vmem:[%s3489_s22 + $0x30] sm:$0xff]  }
  0xa1   : > { %v1779_v10 = vrot.slane %v1777_v46, 1  ;;  %v1188_v46 = vshll.u32 %v3187_v50, 16 }
  0xa2   : > { %981 = vrot.lane.b32.xlu1 %v947_v23, %s3434_s25  ;;  %v918_v32 = vrot.slane %v3368_v20, 1 }
  0xa3   : > { %1093 = vrot.lane.b32.xlu0 %v3796_v1, %s3432_s23  ;;  %1087 = vrot.lane.b32.xlu2 %v3663_v31, %s3432_s23  ;;  %v3365_v1 = vor.u32 %v3364_v25, %v3799_v19  ;;  %v1450_v31 = vsel %vm908_vm1, %v1448_v12, %v1449_v13  ;;  %v1813_v25 = vshll.u32 %v3872_v39, 16  ;;  %v719_v12 = vsel %vm635_vm0, %v3635_v51, %v718_v53 }
  0xa4   : > { %v1854_v7 = vpop.permute.xlu1 %1853  ;;  %v919_v51 = vrot.slane %v3533_v30, 1 }
  0xa5   : > { %v2213_v4 = vsel %vm2211_vm9, %v2180_v27, %v1854_v7  ;;  %v3850_v2 = vpop.permute.xlu0 %959  ;;  %v3854_v26 = vpop.permute.xlu2 %1583  ;;  %v1457_v36 = vrot.slane %v3365_v1, 1  ;;  %v1815_v27 = vrot.slane %v1813_v25, 1  ;;  %v1775_v7 = vor.u32 %v1774_v59, %v1770_v57  ;;  %v2884_v25 = vld [vmem:[%s3489_s22 + $0x5c] sm:$0x1] }
  0xa6   : > { %v2246_v63 = vsel %vm2244_vm10, %v2213_v4, %v3784_v49  ;;  %v3862_v49 = vld [vmem:[%s3489_s22 + $0xa8] sm:$0xff]   ;;  %v1970_v57 = vrot.slane %v3872_v39, 1 }
  0xa7   : > { %2982 = vmatmul.msk.bf16.vlgmr.msra.gmra.mxu0 %vm2297_vm11, %v2246_v63  ;;  %v1808_v19 = vshll.u32 %v3862_v49, 16  ;;  %v1459_v47 = vsel %vm908_vm1, %v1457_v36, %v1458_v58  ;;  %v1806_v23 = vshrl.u32 %v3862_v49, 16  ;;  %v3211_v63 = vld [vmem:[%s3489_s22 + $0x48] sm:$0xf0]  ;;  %v1780_v1 = vsel %vm635_vm0, %v1775_v7, %v1779_v10  ;;  %v3912_v36 = vld [vmem:[%s3489_s22 + $0x54] sm:$0xff]  }
  0xa8   : > { %v3213_v17 = vor.u32 %v3212_v21, %v3211_v63  ;;  %v3915_v58 = vld [vmem:[%s3489_s22 + $0x54] sm:$0xf0]  ;;  %v1224_v7 = vshll.u32 %v3912_v36, 16  ;;  %v1186_v10 = vshrl.u32 %v3187_v50, 16 }
  0xa9   : > { %v1810_v55 = vrot.slane %v1808_v19, 1 }
  0xaa   : > { %1359 = vrot.lane.b32.xlu1 %v1268_v22, %s3436_s27  ;;  %v927_v40 = vrot.slane %v3213_v17, 1 }
  0xab   : > { %1487 = vrot.lane.b32.xlu0 %v1450_v31, %s3435_s26  ;;  %1365 = vrot.lane.b32.xlu2 %v1304_v35, %s3436_s27  ;;  %v3888_v62 = vor.u32 %v1810_v55, %v1806_v23  ;;  %v3269_v31 = vld [vmem:[%s3489_s22 + $0xa8] sm:$0xe]  ;;  %v2881_v35 = vld [vmem:[%s3489_s22 + $0x38] sm:$0x1]  ;;  %v2023_v23 = vsel %vm2013_vm3, %v3558_v5, %v3760_v11 }
  0xac   : > { %v3867_v38 = vpop.permute.xlu1 %965  ;;  %v3270_v19 = vor.u32 %v3269_v31, %v3268_v34  ;;  %v1120_v45 = vunpack.c.l.b16 %v2881_v35  ;;  %v3375_v34 = vld [vmem:[%s3489_s22 + $0x3c] sm:$0xf0]  ;;  %v1222_v35 = vshrl.u32 %v3912_v36, 16 }
  0xad   : > { %v3874_v41 = vpop.permute.xlu0 %1077  ;;  %v3877_v48 = vpop.permute.xlu2 %1861  ;;  %v1816_v22 = vsel %vm635_vm0, %v3888_v62, %v1815_v27  ;;  %v2056_v5 = vsel %vm2046_vm4, %v2023_v23, %v3867_v38  ;;  %v1123_v27 = vunpack.c.l.b16 %v2884_v25 }
  0xae   : > { %v2089_v53 = vsel %vm2079_vm5, %v2056_v5, %v3874_v41 }
  0xaf   : > { %v2122_v41 = vsel %vm2112_vm6, %v2089_v53, %v3829_v52 }
  0xb2   : > { %1493 = vrot.lane.b32.xlu1 %v1459_v47, %s3435_s26  ;;  %v928_v47 = vrot.slane %v3865_v37, 1  ;;  %v1969_v37 = vrot.slane %v3270_v19, 1 }
  0xb3   : > { %1605 = vrot.lane.b32.xlu0 %v3862_v49, %s3437_s28  ;;  %1599 = vrot.lane.b32.xlu2 %v2928_v3, %s3437_s28  ;;  %v3371_v3 = vor.u32 %v3370_v56, %v3838_v60  ;;  %v2017_v60 = vsel %vm2013_vm3, %v3517_v15, %v3809_v28  ;;  %v920_v15 = vsel %vm908_vm1, %v918_v32, %v919_v51  ;;  %v3957_v51 = vld [vmem:[%s3489_s22 + $0x3c] sm:$0xff]  }
  0xb4   : > { %v1344_v61 = vpop.permute.xlu1 %1343  ;;  %v2050_v30 = vsel %vm2046_vm4, %v2017_v60, %v3850_v2  ;;  %v929_v59 = vsel %vm908_vm1, %v927_v40, %v928_v47  ;;  %v1971_v38 = vsel %vm908_vm1, %v1969_v37, %v1970_v57  ;;  %v1139_v32 = vpack.c.b16 %v1123_v27, %v1123_v27  ;;  %v2945_v40 = vld [vmem:[%s3489_s22 + $0x44] sm:$0x1]  ;;  %v3376_v37 = vld [vmem:[%s3489_s22 + $0x3c] sm:$0xe] }
  0xb5   : > { %v1472_v4 = vpop.permute.xlu0 %1471  ;;  %v3892_v13 = vpop.permute.xlu2 %844  ;;  %v1960_v33 = vrot.slane %v3371_v3, 1  ;;  %v2083_v55 = vsel %vm2079_vm5, %v2050_v30, %v3811_v29  ;;  %v1136_v29 = vpack.c.b16 %v1120_v45, %v1120_v45  ;;  %v1190_v3 = vrot.slane %v1188_v46, 1 }
  0xb6   : > { %v2116_v56 = vsel %vm2112_vm6, %v2083_v55, %v1344_v61  ;;  %v1226_v60 = vrot.slane %v1224_v7, 1  ;;  %v1700_v46 = vshll.u32 %v3957_v51, 16 }
  0xb7   : > { %v1962_v2 = vsel %vm908_vm1, %v1960_v33, %v1961_v6  ;;  %v2149_v11 = vsel %vm2145_vm7, %v2116_v56, %v1472_v4  ;;  %v3229_v4 = vld [vmem:[%s3489_s22 + $0x30] sm:$0xf0]  ;;  %v1229_v33 = vshll.u32 %v1139_v32, 16  ;;  %v1191_v6 = vor.u32 %v1190_v3, %v1186_v10  ;;  %v2948_v56 = vld [vmem:[%s3489_s22 + $0x68] sm:$0x1] }
  0xb8   : > { %v2182_v39 = vsel %vm2178_vm8, %v2149_v11, %v3854_v26  ;;  %v3373_v26 = vld [vmem:[%s3489_s22 + $0x54] sm:$0xe]  ;;  %v1227_v23 = vor.u32 %v1226_v60, %v1222_v35  ;;  %v3985_v11 = vld [vmem:[%s3489_s22 + $0x9c] sm:$0xf0]  ;;  %v1635_v53 = vunpack.c.l.b16 %v2948_v56  ;;  %v1698_v10 = vshrl.u32 %v3957_v51, 16 }
  0xb9   : > { %v3374_v45 = vor.u32 %v3373_v26, %v3915_v58  ;;  %v1231_v55 = vrot.slane %v1229_v33, 1  ;;  %v3982_v58 = vld [vmem:[%s3489_s22 + $0x9c] sm:$0xff]   ;;  %v3259_v33 = vld [vmem:[%s3489_s22 + $0x60] sm:$0xf0] }
  0xba   : > { %840 = vrot.lane.b32.xlu1 %v719_v12, %s3433_s24  ;;  %v3230_v12 = vld [vmem:[%s3489_s22 + $0x30] sm:$0xe] }
  0xbb   : > { %1877 = vrot.lane.b32.xlu0 %v1816_v22, %s3438_s29  ;;  %1871 = vrot.lane.b32.xlu2 %v1780_v1, %s3438_s29  ;;  %v1193_v22 = vshll.u32 %v1136_v29, 16  ;;  %v3231_v52 = vor.u32 %v3230_v12, %v3229_v4  ;;  %v1439_v57 = vrot.slane %v3374_v45, 1  ;;  %v1232_v5 = vsel %vm635_vm0, %v1227_v23, %v1231_v55 }
  0xbc   : > { %v1478_v9 = vpop.permute.xlu1 %1477  ;;  %v1702_v4 = vrot.slane %v1700_v46, 1  ;;  %v793_v23 = vshrl.u32 %v3982_v58, 16  ;;  %v3217_v46 = vld [vmem:[%s3489_s22 + $0x78] sm:$0xf0] }
  0xbd   : > { %v1590_v44 = vpop.permute.xlu0 %1589  ;;  %v3921_v28 = vpop.permute.xlu2 %1357  ;;  %v2155_v1 = vsel %vm2145_vm7, %v2122_v41, %v1478_v9  ;;  %v1195_v9 = vrot.slane %v1193_v22, 1  ;;  %v1651_v41 = vpack.c.b16 %v1635_v53, %v1635_v53  ;;  %v349_v22 = vld [vmem:[%s3489_s22 + $0x80] sm:$0x1]  ;;  %v3218_v53 = vld [vmem:[%s3489_s22 + $0x78] sm:$0xe] }
  0xbe   : > { %v2188_v31 = vsel %vm2178_vm8, %v2155_v1, %v1590_v44  ;;  %v1430_v44 = vrot.slane %v3231_v52, 1  ;;  %v1703_v1 = vor.u32 %v1702_v4, %v1698_v10  ;;  %v2891_v10 = vld [vmem:[%s3489_s22 + $0xb0] sm:$0x1] }
  0xbf   : > { %v2221_v19 = vsel %vm2211_vm9, %v2188_v31, %v3877_v48  ;;  %v1741_v26 = vshll.u32 %v1651_v41, 16 }
  0xc2   : > { %963 = vrot.lane.b32.xlu1 %v920_v15, %s3434_s25  ;;  %v1431_v15 = vrot.slane %v1136_v29, 1 }
  0xc3   : > { %1999 = vrot.lane.b32.xlu0 %v1962_v2, %s3439_s30  ;;  %969 = vrot.lane.b32.xlu2 %v929_v59, %s3434_s25  ;;  %v1196_v2 = vsel %vm635_vm0, %v1191_v6, %v1195_v9  ;;  %v1440_v59 = vrot.slane %v1139_v32, 1  ;;  %v3183_v32 = vld [vmem:[%s3489_s22 + $0x78] sm:$0xff]   ;;  %v3260_v6 = vld [vmem:[%s3489_s22 + $0x60] sm:$0xe]  ;;  %v795_v9 = vshll.u32 %v3982_v58, 16 }
  0xc4   : > { %v1856_v61 = vpop.permute.xlu1 %1855  ;;  %v3261_v45 = vor.u32 %v3260_v6, %v3259_v33  ;;  %v757_v56 = vshrl.u32 %v3183_v32, 16 }
  0xc5   : > { %v2215_v20 = vsel %vm2211_vm9, %v2182_v39, %v1856_v61  ;;  %v1984_v63 = vpop.permute.xlu0 %1983  ;;  %v3951_v21 = vpop.permute.xlu2 %838  ;;  %v1441_v27 = vsel %vm908_vm1, %v1439_v57, %v1440_v59  ;;  %v352_v39 = vld [vmem:[%s3489_s22 + $0xa4] sm:$0x1]  ;;  %v797_v55 = vrot.slane %v795_v9, 1  ;;  %v1952_v59 = vrot.slane %v1651_v41, 1 }
  0xc6   : > { %v2248_v17 = vsel %vm2244_vm10, %v2215_v20, %v1984_v63  ;;  %v3377_v20 = vor.u32 %v3376_v37, %v3375_v34  ;;  %v2031_v63 = vsel %vm2013_vm3, %v3623_v16, %v3892_v13  ;;  %v616_v3 = vunpack.c.l.b16 %v352_v39  ;;  %v3381_v39 = vld [vmem:[%s3489_s22 + $0x84] sm:$0xf0] }
  0xc7   : > { %2983 = vmatmul.msk.bf16.gmra.mxu0 %vm2297_vm11, %v2248_v17  ;;  %v613_v34 = vunpack.c.l.b16 %v349_v22  ;;  %v1951_v57 = vrot.slane %v3261_v45, 1  ;;  %v3219_v22 = vor.u32 %v3218_v53, %v3217_v46  ;;  %v3245_v46 = vld [vmem:[%s3489_s22 + $0xa8] sm:$0xe] }
  0xc8   : > { %v1942_v35 = vrot.slane %v3377_v20, 1  ;;  %v4008_v13 = vpack.c.b16 %v616_v3, %v616_v3 }
  0xc9   : > { %v1953_v3 = vsel %vm908_vm1, %v1951_v57, %v1952_v59 }
  0xca   : > { %2005 = vrot.lane.b32.xlu1 %v1971_v38, %s3439_s30 }
  0xcb   : > { %1081 = vrot.lane.b32.xlu0 %v3912_v36, %s3432_s23  ;;  %1075 = vrot.lane.b32.xlu2 %v3187_v50, %s3432_s23  ;;  %v1632_v36 = vunpack.c.l.b16 %v2945_v40  ;;  %v1432_v50 = vsel %vm908_vm1, %v1430_v44, %v1431_v15 }
  0xcc   : > { %v1990_v30 = vpop.permute.xlu1 %1989 }
  0xcd   : > { %v2254_v47 = vsel %vm2244_vm10, %v2221_v19, %v1990_v30  ;;  %v974_v48 = vpop.permute.xlu0 %973  ;;  %v3974_v25 = vpop.permute.xlu2 %967  ;;  %v1648_v29 = vpack.c.b16 %v1632_v36, %v1632_v36  ;;  %v1743_v30 = vrot.slane %v1741_v26, 1  ;;  %v759_v19 = vshll.u32 %v3183_v32, 16 }
  0xce   : > { %2986 = vmatmul.msk.bf16.vlgmr.msra.gmra.mxu1 %vm2297_vm11, %v2254_v47  ;;  %v2064_v31 = vsel %vm2046_vm4, %v2031_v63, %v974_v48  ;;  %v800_v48 = vshll.u32 %v4008_v13, 16 }
  0xcf   : > { %v1705_v12 = vshll.u32 %v1648_v29, 16  ;;  %v1943_v60 = vrot.slane %v1648_v29, 1  ;;  %v761_v37 = vrot.slane %v759_v19, 1 }
  0xd1   : > { %v1707_v17 = vrot.slane %v1705_v12, 1  ;;  %v762_v12 = vor.u32 %v761_v37, %v757_v56 }
  0xd2   : > { %1347 = vrot.lane.b32.xlu1 %v1196_v2, %s3436_s27  ;;  %v1744_v2 = vsel %vm635_vm0, %v3653_v18, %v1743_v30  ;;  %v3382_v30 = vld [vmem:[%s3489_s22 + $0x84] sm:$0xe] }
  0xd3   : > { %1475 = vrot.lane.b32.xlu0 %v1432_v50, %s3435_s26  ;;  %1353 = vrot.lane.b32.xlu2 %v1232_v5, %s3436_s27  ;;  %v1708_v44 = vsel %vm635_vm0, %v1703_v1, %v1707_v17  ;;  %v3379_v5 = vld [vmem:[%s3489_s22 + $0x9c] sm:$0xe]  ;;  %v1130_v1 = vunpack.c.l.b16 %v2891_v10  ;;  %v2888_v17 = vld [vmem:[%s3489_s22 + $0x8c] sm:$0x1]  ;;  %v3383_v37 = vor.u32 %v3382_v30, %v3381_v39 }
  0xd4   : > { %v1086_v61 = vpop.permute.xlu1 %1085 }
  0xd5   : > { %v1486_v38 = vpop.permute.xlu0 %1485  ;;  %v3992_v7 = vpop.permute.xlu2 %1079  ;;  %v2097_v40 = vsel %vm2079_vm5, %v2064_v31, %v1086_v61  ;;  %v802_v61 = vrot.slane %v800_v48, 1  ;;  %v4046_v6 = vpack.c.b16 %v1130_v1, %v1130_v1 }
  0xd6   : > { %v2130_v36 = vsel %vm2112_vm6, %v2097_v40, %v3921_v28  ;;  %v798_v28 = vor.u32 %v797_v55, %v793_v23  ;;  %v949_v40 = vrot.slane %v4008_v13, 1  ;;  %v4057_v13 = vld [vmem:[%s3489_s22 + $0x54] sm:$0xff]  }
  0xd7   : > { %v2163_v18 = vsel %vm2145_vm7, %v2130_v36, %v1486_v38  ;;  %v1313_v45 = vshll.u32 %v4046_v6, 16 }
  0xd8   : > { %v803_v32 = vsel %vm635_vm0, %v798_v28, %v802_v61  ;;  %v346_v28 = vld [vmem:[%s3489_s22 + $0x5c] sm:$0x1] }
  0xd9   : > { %v1315_v56 = vrot.slane %v1313_v45, 1  ;;  %v3331_v61 = vld [vmem:[%s3489_s22 + $0x18] sm:$0xff]   ;;  %v721_v45 = vshrl.u32 %v4057_v13, 16 }
  0xda   : > { %1481 = vrot.lane.b32.xlu1 %v1441_v27, %s3435_s26  ;;  %v2866_v27 = vld [vmem:[%s3489_s22 + $0x84] sm:$0xff]   ;;  %v2019_v10 = vsel %vm2013_vm3, %v3331_v61, %v3775_v43 }
  0xdb   : > { %1593 = vrot.lane.b32.xlu0 %v3623_v16, %s3437_s28  ;;  %1587 = vrot.lane.b32.xlu2 %v3957_v51, %s3437_s28  ;;  %v1944_v16 = vsel %vm908_vm1, %v1942_v35, %v1943_v60  ;;  %v629_v51 = vpack.c.b16 %v613_v34, %v613_v34  ;;  %v939_v35 = vrot.slane %v3219_v22, 1  ;;  %v1127_v34 = vunpack.c.l.b16 %v2888_v17  ;;  %v2955_v17 = vld [vmem:[%s3489_s22 + $0xbc] sm:$0x1] }
  0xdc   : > { %v1598_v52 = vpop.permute.xlu1 %1597  ;;  %v1272_v9 = vshll.u32 %v2866_v27, 16  ;;  %v1270_v23 = vshrl.u32 %v2866_v27, 16  ;;  %v1316_v39 = vsel %vm635_vm0, %v3888_v62, %v1315_v56  ;;  %v3265_v56 = vld [vmem:[%s3489_s22 + $0x90] sm:$0xf0] }
  0xdd   : > { %v1870_v47 = vpop.permute.xlu0 %1869  ;;  %v4013_v15 = vpop.permute.xlu2 %1473  ;;  %v764_v50 = vshll.u32 %v629_v51, 16  ;;  %v2196_v4 = vsel %vm2178_vm8, %v2163_v18, %v1598_v52  ;;  %v3380_v52 = vor.u32 %v3379_v5, %v3985_v11  ;;  %v940_v60 = vrot.slane %v629_v51, 1  ;;  %v3244_v5 = vld [vmem:[%s3489_s22 + $0xa8] sm:$0xf0] }
  0xde   : > { %v2229_v20 = vsel %vm2211_vm9, %v2196_v4, %v1870_v47  ;;  %v1274_v55 = vrot.slane %v1272_v9, 1  ;;  %v4079_v4 = vld [vmem:[%s3489_s22 + $0xb4] sm:$0xff]  }
  0xdf   : > { %v766_v41 = vrot.slane %v764_v50, 1  ;;  %v948_v19 = vrot.slane %v3380_v52, 1  ;;  %v941_v11 = vsel %vm908_vm1, %v939_v35, %v940_v60  ;;  %v2952_v50 = vld [vmem:[%s3489_s22 + $0x98] sm:$0x1]  ;;  %v723_v60 = vshll.u32 %v4057_v13, 16 }
  0xe0   : > { %v1275_v57 = vor.u32 %v1274_v55, %v1270_v23  ;;  %v3385_v55 = vld [vmem:[%s3489_s22 + $0x54] sm:$0xe] }
  0xe1   : > { %v767_v31 = vsel %vm635_vm0, %v762_v12, %v766_v41  ;;  %v950_v51 = vsel %vm908_vm1, %v948_v19, %v949_v40  ;;  %v4082_v12 = vld [vmem:[%s3489_s22 + $0xb4] sm:$0xf0]  ;;  %v1642_v19 = vunpack.c.l.b16 %v2955_v17 }
  0xe2   : > { %1859 = vrot.lane.b32.xlu1 %v1708_v44, %s3438_s29 }
  0xe3   : > { %1987 = vrot.lane.b32.xlu0 %v1944_v16, %s3439_s30  ;;  %1865 = vrot.lane.b32.xlu2 %v1744_v2, %s3438_s29  ;;  %v1143_v16 = vpack.c.b16 %v1127_v34, %v1127_v34  ;;  %v4060_v2 = vld [vmem:[%s3489_s22 + $0x54] sm:$0xf0]  ;;  %v4121_v23 = vpack.c.b16 %v1642_v19, %v1642_v19 }
  0xe4   : > { %v4024_v29 = vpop.permute.xlu1 %961 }
  0xe5   : > { %v1998_v63 = vpop.permute.xlu0 %1997  ;;  %v4037_v38 = vpop.permute.xlu2 %1591  ;;  %v1277_v48 = vshll.u32 %v1143_v16, 16  ;;  %v2052_v41 = vsel %vm2046_vm4, %v2019_v10, %v4024_v29  ;;  %v1825_v10 = vshll.u32 %v4121_v23, 16 }
  0xe6   : > { %v2262_v26 = vsel %vm2244_vm10, %v2229_v20, %v1998_v63  ;;  %v1451_v20 = vrot.slane %v3383_v37, 1  ;;  %v1639_v63 = vunpack.c.l.b16 %v2952_v50  ;;  %v3266_v50 = vld [vmem:[%s3489_s22 + $0x90] sm:$0xe] }
  0xe7   : > { %2990 = vmatmul.msk.bf16.vlgmr.msra.gmra.mxu2 %vm2297_vm11, %v2262_v26  ;;  %v1279_v59 = vrot.slane %v1277_v48, 1  ;;  %v1452_v26 = vrot.slane %v1143_v16, 1  ;;  %v725_v16 = vrot.slane %v723_v60, 1 }
  0xe8   : > { %v4094_v29 = vpack.c.b16 %v1639_v63, %v1639_v63 }
  0xe9   : > { %v1453_v9 = vsel %vm908_vm1, %v1451_v20, %v1452_v26  ;;  %v4151_v26 = vld [vmem:[%s3489_s22 + $0x6c] sm:$0xf0] }
  0xea   : > { %1993 = vrot.lane.b32.xlu1 %v1953_v3, %s3439_s30  ;;  %v3246_v3 = vor.u32 %v3245_v46, %v3244_v5  ;;  %v1789_v40 = vshll.u32 %v4094_v29, 16  ;;  %v2885_v5 = vld [vmem:[%s3489_s22 + $0x68] sm:$0x1]  ;;  %v1964_v17 = vrot.slane %v4094_v29, 1 }
  0xeb   : > { %854 = vrot.lane.b32.xlu0 %v803_v32, %s3433_s24  ;;  %848 = vrot.lane.b32.xlu2 %v767_v31, %s3433_s24  ;;  %v1461_v31 = vrot.slane %v4046_v6, 1 }
  0xec   : > { %v1074_v33 = vpop.permute.xlu1 %1073  ;;  %v1460_v32 = vrot.slane %v3246_v3, 1  ;;  %v3189_v3 = vld [vmem:[%s3489_s22 + $0x60] sm:$0xff]  }
  0xed   : > { %v1346_v47 = vpop.permute.xlu0 %1345  ;;  %v1986_v44 = vpop.permute.xlu2 %1985  ;;  %v2085_v43 = vsel %vm2079_vm5, %v2052_v41, %v1074_v33  ;;  %v1124_v41 = vunpack.c.l.b16 %v2885_v5  ;;  %v350_v5 = vld [vmem:[%s3489_s22 + $0x8c] sm:$0x1] }
  0xee   : > { %v2118_v22 = vsel %vm2112_vm6, %v2085_v43, %v1346_v47  ;;  %v1462_v47 = vsel %vm908_vm1, %v1460_v32, %v1461_v31  ;;  %v3386_v43 = vor.u32 %v3385_v55, %v4060_v2  ;;  %v1236_v32 = vshll.u32 %v3189_v3, 16 }
  0xef   : > { %v2151_v52 = vsel %vm2145_vm7, %v2118_v22, %v4013_v15  ;;  %v4148_v22 = vld [vmem:[%s3489_s22 + $0x6c] sm:$0xff]  }
  0xf0   : > { %v930_v31 = vrot.slane %v3386_v43, 1  ;;  %v1238_v29 = vrot.slane %v1236_v32, 1  ;;  %v1748_v55 = vshll.u32 %v4148_v22, 16 }
  0xf2   : > { %977 = vrot.lane.b32.xlu1 %v941_v11, %s3434_s25 }
  0xf3   : > { %1089 = vrot.lane.b32.xlu0 %v2866_v27, %s3432_s23  ;;  %983 = vrot.lane.b32.xlu2 %v950_v51, %s3434_s25  ;;  %v2025_v27 = vsel %vm2013_vm3, %v3646_v0, %v3951_v21  ;;  %v1280_v0 = vsel %vm635_vm0, %v1275_v57, %v1279_v59  ;;  %v610_v21 = vunpack.c.l.b16 %v346_v28  ;;  %v1820_v51 = vshll.u32 %v4079_v4, 16 }
  0xf4   : > { %v1352_v36 = vpop.permute.xlu1 %1351  ;;  %v726_v57 = vor.u32 %v725_v16, %v721_v45 }
  0xf5   : > { %v1480_v53 = vpop.permute.xlu0 %1479  ;;  %v4067_v18 = vpop.permute.xlu2 %852  ;;  %v4101_v35 = vpack.c.b16 %v610_v21, %v610_v21  ;;  %v1822_v61 = vrot.slane %v1820_v51, 1  ;;  %v1827_v21 = vrot.slane %v1825_v10, 1 }
  0xf7   : > { %v931_v2 = vrot.slane %v4101_v35, 1 }
  0xfa   : > { %1095 = vrot.lane.b32.xlu1 %v3862_v49, %s3432_s23  ;;  %v2058_v49 = vsel %vm2046_vm4, %v2025_v27, %v3974_v25 }
  0xfb   : > { %1367 = vrot.lane.b32.xlu0 %v1316_v39, %s3436_s27  ;;  %1361 = vrot.lane.b32.xlu2 %v1280_v0, %s3436_s27  ;;  %v2091_v25 = vsel %vm2079_vm5, %v2058_v49, %v3992_v7  ;;  %v728_v7 = vshll.u32 %v4101_v35, 16  ;;  %v3267_v39 = vor.u32 %v3266_v50, %v3265_v56  ;;  %v3391_v50 = vld [vmem:[%s3489_s22 + $0x6c] sm:$0xe] }
  0xfc   : > { %v1586_v1 = vpop.permute.xlu1 %1585  ;;  %v2124_v11 = vsel %vm2112_vm6, %v2091_v25, %v1352_v36  ;;  %v1791_v36 = vrot.slane %v1789_v40, 1  ;;  %v1973_v40 = vrot.slane %v4121_v23, 1  ;;  %v353_v23 = vld [vmem:[%s3489_s22 + $0xb0] sm:$0x1] }
  0xfd   : > { %v2184_v33 = vsel %vm2178_vm8, %v2151_v52, %v1586_v1  ;;  %v1858_v34 = vpop.permute.xlu0 %1857  ;;  %v4106_v30 = vpop.permute.xlu2 %1087  ;;  %v730_v59 = vrot.slane %v728_v7, 1  ;;  %v4177_v7 = vld [vmem:[%s3489_s22 + $0x84] sm:$0xff]  }
  0xfe   : > { %v2217_v6 = vsel %vm2211_vm9, %v2184_v33, %v1858_v34  ;;  %v1792_v20 = vsel %vm635_vm0, %v3805_v24, %v1791_v36  ;;  %v1140_v24 = vpack.c.b16 %v1124_v41, %v1124_v41  ;;  %v2949_v34 = vld [vmem:[%s3489_s22 + $0x74] sm:$0x1] }
  0xff   : > { %v2250_v15 = vsel %vm2244_vm10, %v2217_v6, %v1986_v44  ;;  %v2157_v44 = vsel %vm2145_vm7, %v2124_v11, %v1480_v53  ;;  %v731_v63 = vsel %vm635_vm0, %v726_v57, %v730_v59  ;;  %v932_v6 = vsel %vm908_vm1, %v930_v31, %v931_v2  ;;  %v3236_v11 = vld [vmem:[%s3489_s22 + $0x60] sm:$0xe] }
 0x100   : > { %2984 = vmatmul.msk.bf16.gmra.mxu0 %vm2297_vm11, %v2250_v15  ;;  %v2190_v37 = vsel %vm2178_vm8, %v2157_v44, %v4037_v38  ;;  %v3388_v38 = vld [vmem:[%s3489_s22 + $0xb4] sm:$0xe]  ;;  %v1241_v19 = vshll.u32 %v1140_v24, 16  ;;  %v1636_v25 = vunpack.c.l.b16 %v2949_v34  ;;  %v4180_v44 = vld [vmem:[%s3489_s22 + $0x84] sm:$0xf0]  ;;  %v617_v59 = vunpack.c.l.b16 %v353_v23 }
 0x101   : > { %v3389_v33 = vor.u32 %v3388_v38, %v4082_v12  ;;  %v3235_v12 = vld [vmem:[%s3489_s22 + $0x60] sm:$0xf0]  ;;  %v1443_v10 = vrot.slane %v1140_v24, 1  ;;  %v614_v38 = vunpack.c.l.b16 %v350_v5  ;;  %v769_v31 = vshrl.u32 %v4177_v7, 16  ;;  %v2889_v23 = vld [vmem:[%s3489_s22 + $0x98] sm:$0x1] }
 0x102   : > { %1489 = vrot.lane.b32.xlu1 %v1453_v9, %s3435_s26  ;;  %v1234_v9 = vshrl.u32 %v3189_v3, 16  ;;  %v1243_v16 = vrot.slane %v1241_v19, 1  ;;  %v1652_v51 = vpack.c.b16 %v1636_v25, %v1636_v25 }
 0x103   : > { %1601 = vrot.lane.b32.xlu0 %v3773_v42, %s3437_s28  ;;  %1495 = vrot.lane.b32.xlu2 %v1462_v47, %s3435_s26  ;;  %v1818_v42 = vshrl.u32 %v4079_v4, 16  ;;  %v1972_v15 = vrot.slane %v3389_v33, 1  ;;  %v630_v24 = vpack.c.b16 %v614_v38, %v614_v38 }
 0x104   : > { %v1864_v48 = vpop.permute.xlu1 %1863  ;;  %v1239_v45 = vor.u32 %v1238_v29, %v1234_v9  ;;  %v1955_v34 = vrot.slane %v1652_v51, 1  ;;  %v4216_v9 = vld [vmem:[%s3489_s22 + $0xb4] sm:$0xf0] }
 0x105   : > { %v2223_v46 = vsel %vm2211_vm9, %v2190_v37, %v1864_v48  ;;  %v1992_v53 = vpop.permute.xlu0 %1991  ;;  %v4133_v28 = vpop.permute.xlu2 %1365  ;;  %v1823_v0 = vor.u32 %v1822_v61, %v1818_v42  ;;  %v1974_v36 = vsel %vm908_vm1, %v1972_v15, %v1973_v40  ;;  %v3237_v37 = vor.u32 %v3236_v11, %v3235_v12 }
 0x106   : > { %v2256_v27 = vsel %vm2244_vm10, %v2223_v46, %v1992_v53  ;;  %v1244_v57 = vsel %vm635_vm0, %v1239_v45, %v1243_v16  ;;  %v1746_v46 = vshrl.u32 %v4148_v22, 16  ;;  %v1750_v53 = vrot.slane %v1748_v55, 1  ;;  %v2892_v45 = vld [vmem:[%s3489_s22 + $0xbc] sm:$0x1]  ;;  %v3223_v16 = vld [vmem:[%s3489_s22 + $0xa8] sm:$0xf0] }
 0x107   : > { %2987 = vmatmul.msk.bf16.gmra.mxu1 %vm2297_vm11, %v2256_v27  ;;  %v1828_v52 = vsel %vm635_vm0, %v1823_v0, %v1827_v21  ;;  %v1753_v42 = vshll.u32 %v1652_v51, 16  ;;  %v1442_v61 = vrot.slane %v3237_v37, 1  ;;  %v3392_v21 = vor.u32 %v3391_v50, %v4151_v26  ;;  %v4213_v26 = vld [vmem:[%s3489_s22 + $0xb4] sm:$0xff]   ;;  %v3224_v51 = vld [vmem:[%s3489_s22 + $0xa8] sm:$0xe] }
 0x108   : > { %v1751_v41 = vor.u32 %v1750_v53, %v1746_v46  ;;  %v3225_v37 = vor.u32 %v3224_v51, %v3223_v16  ;;  %v3191_v46 = vld [vmem:[%s3489_s22 + $0x90] sm:$0xff]   ;;  %v1128_v53 = vunpack.c.l.b16 %v2889_v23  ;;  %v2956_v16 = vld [vmem:[%s3489_s22 + $0xc8] sm:$0x1] }
 0x109   : > { %v1444_v0 = vsel %vm908_vm1, %v1442_v61, %v1443_v10  ;;  %v1954_v33 = vrot.slane %v3392_v21, 1 }
 0x10a   : > { %1607 = vrot.lane.b32.xlu1 %v4079_v4, %s3437_s28  ;;  %v1963_v4 = vrot.slane %v3267_v39, 1  ;;  %v4198_v39 = vpack.c.b16 %v617_v59, %v617_v59  ;;  %v951_v61 = vrot.slane %v3225_v37, 1 }
 0x10b   : > { %1873 = vrot.lane.b32.xlu0 %v1792_v20, %s3438_s29  ;;  %842 = vrot.lane.b32.xlu2 %v731_v63, %s3433_s24  ;;  %v1755_v20 = vrot.slane %v1753_v42, 1  ;;  %v771_v63 = vshll.u32 %v4177_v7, 16  ;;  %v1956_v40 = vsel %vm908_vm1, %v1954_v33, %v1955_v34 }
 0x10c   : > { %v4153_v1 = vpop.permute.xlu1 %846  ;;  %v1965_v35 = vsel %vm908_vm1, %v1963_v4, %v1964_v17  ;;  %v3394_v17 = vld [vmem:[%s3489_s22 + $0x84] sm:$0xe]  ;;  %v952_v10 = vrot.slane %v4198_v39, 1 }
 0x10d   : > { %v4159_v49 = vpop.permute.xlu0 %975  ;;  %v4162_v60 = vpop.permute.xlu2 %1599  ;;  %v1756_v32 = vsel %vm635_vm0, %v1751_v41, %v1755_v20  ;;  %v773_v2 = vrot.slane %v771_v63, 1  ;;  %v3395_v12 = vor.u32 %v3394_v17, %v4180_v44  ;;  %v2033_v44 = vsel %vm2013_vm3, %v3733_v54, %v4153_v1 }
 0x10e   : > { %v2066_v59 = vsel %vm2046_vm4, %v2033_v44, %v4159_v49  ;;  %v1284_v1 = vshll.u32 %v3191_v46, 16  ;;  %v1320_v49 = vshll.u32 %v4213_v26, 16  ;;  %v4309_v44 = vld [vmem:[%s3489_s22 + $0xc0] sm:$0xff]  }
 0x10f   : > { %v942_v50 = vrot.slane %v3395_v12, 1  ;;  %v2099_v38 = vsel %vm2079_vm5, %v2066_v59, %v4106_v30  ;;  %v4293_v12 = vld [vmem:[%s3489_s22 + $0x9c] sm:$0xff]  }
 0x112   : > { %1879 = vrot.lane.b32.xlu1 %v1828_v52, %s3438_s29  ;;  %v776_v52 = vshll.u32 %v630_v24, 16 }
 0x113   : > { %2001 = vrot.lane.b32.xlu0 %v1965_v35, %s3439_s30  ;;  %971 = vrot.lane.b32.xlu2 %v932_v6, %s3434_s25  ;;  %v774_v6 = vor.u32 %v773_v2, %v769_v31  ;;  %v1322_v31 = vrot.slane %v1320_v49, 1  ;;  %v953_v2 = vsel %vm908_vm1, %v951_v61, %v952_v10 }
 0x114   : > { %v4170_v47 = vpop.permute.xlu1 %981  ;;  %v778_v25 = vrot.slane %v776_v52, 1  ;;  %v3397_v52 = vld [vmem:[%s3489_s22 + $0xb4] sm:$0xe] }
 0x115   : > { %v4184_v48 = vpop.permute.xlu0 %1093  ;;  %v4187_v56 = vpop.permute.xlu2 %1871 }
 0x11a   : > { %2007 = vrot.lane.b32.xlu1 %v1974_v36, %s3439_s30  ;;  %v779_v36 = vsel %vm635_vm0, %v774_v6, %v778_v25  ;;  %v3242_v6 = vld [vmem:[%s3489_s22 + $0x90] sm:$0xe] }
 0x11b   : > { %1355 = vrot.lane.b32.xlu0 %v1244_v57, %s3436_s27  ;;  %1083 = vrot.lane.b32.xlu2 %v3189_v3, %s3432_s23  ;;  %v812_v3 = vshll.u32 %v4198_v39, 16  ;;  %v943_v57 = vrot.slane %v630_v24, 1  ;;  %v1144_v39 = vpack.c.b16 %v1128_v53, %v1128_v53  ;;  %v1282_v24 = vshrl.u32 %v3191_v46, 16  ;;  %v4319_v53 = vld [vmem:[%s3489_s22 + $0xb4] sm:$0xff]  }
 0x11c   : > { %v4194_v27 = vpop.permute.xlu1 %1359 }
 0x11d   : > { %v4201_v43 = vpop.permute.xlu0 %1487  ;;  %v4205_v4 = vpop.permute.xlu2 %969  ;;  %v814_v35 = vrot.slane %v812_v3, 1  ;;  %v944_v20 = vsel %vm908_vm1, %v942_v50, %v943_v57  ;;  %v2132_v17 = vsel %vm2112_vm6, %v2099_v38, %v4194_v27  ;;  %v1286_v3 = vrot.slane %v1284_v1, 1  ;;  %v2953_v57 = vld [vmem:[%s3489_s22 + $0xa4] sm:$0x1] }
 0x11e   : > { %v2165_v30 = vsel %vm2145_vm7, %v2132_v17, %v4201_v43  ;;  %v1289_v27 = vshll.u32 %v1144_v39, 16  ;;  %v1643_v50 = vunpack.c.l.b16 %v2956_v16  ;;  %v1455_v61 = vrot.slane %v1144_v39, 1 }
 0x11f   : > { %v815_v55 = vsel %vm635_vm0, %v3888_v62, %v814_v35  ;;  %v2198_v43 = vsel %vm2178_vm8, %v2165_v30, %v4162_v60  ;;  %v3241_v35 = vld [vmem:[%s3489_s22 + $0x90] sm:$0xf0]  ;;  %v1640_v38 = vunpack.c.l.b16 %v2953_v57 }
 0x120   : > { %v1291_v51 = vrot.slane %v1289_v27, 1  ;;  %v3243_v23 = vor.u32 %v3242_v6, %v3241_v35  ;;  %v819_v6 = vshll.u32 %v4319_v53, 16 }
 0x122   : > { %1483 = vrot.lane.b32.xlu1 %v1444_v0, %s3435_s26  ;;  %v3332_v0 = vld [vmem:[%s3489_s22 + $0x90] sm:$0xff]   ;;  %v1454_v49 = vrot.slane %v3243_v23, 1  ;;  %v821_v57 = vrot.slane %v819_v6, 1 }
 0x123   : > { %1867 = vrot.lane.b32.xlu0 %v1756_v32, %s3438_s29  ;;  %1595 = vrot.lane.b32.xlu2 %v4148_v22, %s3437_s28  ;;  %v1131_v22 = vunpack.c.l.b16 %v2892_v45  ;;  %v2039_v21 = vsel %vm2013_vm3, %v3332_v0, %v4067_v18  ;;  %v1318_v32 = vshrl.u32 %v4213_v26, 16  ;;  %v4296_v45 = vld [vmem:[%s3489_s22 + $0x9c] sm:$0xf0]  ;;  %v4331_v0 = vpack.c.b16 %v1643_v50, %v1643_v50 }
 0x124   : > { %v4218_v29 = vpop.permute.xlu1 %1493  ;;  %v4220_v19 = vpop.f32.mrf.mxu0  ;;  %v2072_v33 = vsel %vm2046_vm4, %v2039_v21, %v4170_v47  ;;  %v1456_v39 = vsel %vm908_vm1, %v1454_v49, %v1455_v61  ;;  %v817_v50 = vshrl.u32 %v4319_v53, 16 }
 0x125   : > { %v4225_v15 = vpop.permute.xlu0 %1605  ;;  %v4229_v11 = vpop.permute.xlu2 %1075  ;;  %v4260_v42 = vpack.c.b16 %v1131_v22, %v1131_v22  ;;  %v2105_v25 = vsel %vm2079_vm5, %v2072_v33, %v4184_v48  ;;  %v1323_v47 = vor.u32 %v1322_v31, %v1318_v32  ;;  %v2231_v48 = vsel %vm2211_vm9, %v2198_v43, %v4187_v56 }
 0x126   : > { %v2138_v37 = vsel %vm2112_vm6, %v2105_v25, %v4133_v28  ;;  %v4322_v28 = vld [vmem:[%s3489_s22 + $0xb4] sm:$0xf0]  ;;  %v1656_v32 = vpack.c.b16 %v1640_v38, %v1640_v38 }
 0x127   : > { %v1325_v18 = vshll.u32 %v4260_v42, 16  ;;  %v2171_v59 = vsel %vm2145_vm7, %v2138_v37, %v4218_v29  ;;  %v3403_v37 = vld [vmem:[%s3489_s22 + $0xb4] sm:$0xe] }
 0x128   : > { %v2204_v1 = vsel %vm2178_vm8, %v2171_v59, %v4225_v15  ;;  %v354_v15 = vld [vmem:[%s3489_s22 + $0xbc] sm:$0x1]  ;;  %v1801_v33 = vshll.u32 %v1656_v32, 16  ;;  %v1967_v61 = vrot.slane %v1656_v32, 1 }
 0x129   : > { %v1327_v60 = vrot.slane %v1325_v18, 1  ;;  %v1837_v18 = vshll.u32 %v4331_v0, 16 }
 0x12a   : > { %1995 = vrot.lane.b32.xlu1 %v1956_v40, %s3439_s30  ;;  %v1287_v40 = vor.u32 %v1286_v3, %v1282_v24  ;;  %v1830_v24 = vshrl.u32 %v4309_v44, 16  ;;  %v3400_v3 = vld [vmem:[%s3489_s22 + $0x9c] sm:$0xe] }
 0x12b   : > { %856 = vrot.lane.b32.xlu0 %v815_v55, %s3433_s24  ;;  %850 = vrot.lane.b32.xlu2 %v779_v36, %s3433_s24  ;;  %v1328_v56 = vsel %vm635_vm0, %v1323_v47, %v1327_v60  ;;  %v1839_v47 = vrot.slane %v1837_v18, 1  ;;  %v2893_v60 = vld [vmem:[%s3489_s22 + $0xc8] sm:$0x1] }
 0x12c   : > { %v4245_v5 = vpop.permute.xlu1 %840  ;;  %v4252_v62 = vpop.f32.mrf.mxu0  ;;  %v3333_v18 = vld [vmem:[%s3489_s22 + $0x48] sm:$0xff]  }
 0x12d   : > { %v3102_v54 = vpack.c.bf16 %v4252_v62, %v4220_v19  ;;  %v1878_v41 = vpop.permute.xlu0 %1877  ;;  %v4267_v63 = vpop.permute.xlu2 %1353 }
 0x12e   : > { %v2237_v29 = vsel %vm2211_vm9, %v2204_v1, %v1878_v41  ;;  %v1464_v41 = vrot.slane %v4260_v42, 1  ;;  %v1794_v42 = vshrl.u32 %v4293_v12, 16 }
 0x12f   : > { %3103 = vst [vmem:[%s4250_s14] sm:$0xff] %v3102_v54   ;;  %v3398_v54 = vor.u32 %v3397_v52, %v4216_v9  ;;  %v1796_v9 = vshll.u32 %v4293_v12, 16 }
 0x131   : > { %v1463_v21 = vrot.slane %v3398_v54, 1  ;;  %v1798_v52 = vrot.slane %v1796_v9, 1  ;;  %v822_v9 = vor.u32 %v821_v57, %v817_v50 }
 0x132   : > { %979 = vrot.lane.b32.xlu1 %v944_v20, %s3434_s25 }
 0x133   : > { %1091 = vrot.lane.b32.xlu0 %v3191_v46, %s3432_s23  ;;  %985 = vrot.lane.b32.xlu2 %v953_v2, %s3434_s25  ;;  %v1292_v46 = vsel %vm635_vm0, %v1287_v40, %v1291_v51  ;;  %v618_v2 = vunpack.c.l.b16 %v354_v15  ;;  %v1465_v27 = vsel %vm908_vm1, %v1463_v21, %v1464_v41  ;;  %v1799_v16 = vor.u32 %v1798_v52, %v1794_v42 }
 0x134   : > { %v4285_v34 = vpop.permute.xlu1 %963  ;;  %v1803_v51 = vrot.slane %v1801_v33, 1 }
 0x135   : > { %v2000_v55 = vpop.permute.xlu0 %1999  ;;  %v4302_v22 = vpop.permute.xlu2 %1587  ;;  %v4351_v35 = vpack.c.b16 %v618_v2, %v618_v2  ;;  %v2027_v2 = vsel %vm2013_vm3, %v3333_v18, %v4245_v5 }
 0x136   : > { %v2264_v36 = vsel %vm2244_vm10, %v2231_v48, %v2000_v55  ;;  %v3401_v55 = vor.u32 %v3400_v3, %v4296_v45  ;;  %v1804_v45 = vsel %vm635_vm0, %v1799_v16, %v1803_v51  ;;  %v3404_v3 = vor.u32 %v3403_v37, %v4322_v28 }
 0x137   : > { %2991 = vmatmul.msk.bf16.gmra.mxu2 %vm2297_vm11, %v2264_v36  ;;  %v3272_v36 = vld [vmem:[%s3489_s22 + $0xc0] sm:$0xe]  ;;  %v824_v59 = vshll.u32 %v4351_v35, 16  ;;  %v2060_v5 = vsel %vm2046_vm4, %v2027_v2, %v4205_v4 }
 0x138   : > { %v1966_v49 = vrot.slane %v3401_v55, 1  ;;  %v3247_v55 = vld [vmem:[%s3489_s22 + $0xc0] sm:$0xf0] }
 0x139   : > { %v826_v15 = vrot.slane %v824_v59, 1 }
 0x13a   : > { %1097 = vrot.lane.b32.xlu1 %v4213_v26, %s3432_s23  ;;  %v1832_v26 = vshll.u32 %v4309_v44, 16 }
 0x13b   : > { %1369 = vrot.lane.b32.xlu0 %v1328_v56, %s3436_s27  ;;  %1363 = vrot.lane.b32.xlu2 %v1292_v46, %s3436_s27  ;;  %v1132_v56 = vunpack.c.l.b16 %v2893_v60  ;;  %v955_v60 = vrot.slane %v4351_v35, 1 }
 0x13c   : > { %v2006_v10 = vpop.permute.xlu1 %2005  ;;  %v1834_v31 = vrot.slane %v1832_v26, 1  ;;  %v2021_v26 = vsel %vm2013_vm3, %v3507_v8, %v3793_v14  ;;  %v1976_v8 = vrot.slane %v4331_v0, 1  ;;  %v827_v0 = vsel %vm635_vm0, %v822_v9, %v826_v15 }
 0x13d   : > { %v2270_v20 = vsel %vm2244_vm10, %v2237_v29, %v2006_v10  ;;  %v4338_v17 = vpop.permute.xlu0 %1081  ;;  %v4341_v30 = vpop.permute.xlu2 %1865  ;;  %v4376_v29 = vld [vmem:[%s3489_s22 + $0xcc] sm:$0xff]   ;;  %v4387_v21 = vpack.c.b16 %v1132_v56, %v1132_v56 }
 0x13e   : > { %2994 = vmatmul.msk.bf16.vlgmr.msra.gmra.mxu3 %vm2297_vm11, %v2270_v20  ;;  %v4357_v40 = vor.u32 %v1834_v31, %v1830_v24  ;;  %v4379_v10 = vld [vmem:[%s3489_s22 + $0xcc] sm:$0xf0]  ;;  %v2054_v20 = vsel %vm2046_vm4, %v2021_v26, %v4285_v34  ;;  %v1968_v34 = vsel %vm908_vm1, %v1966_v49, %v1967_v61  ;;  %v2957_v31 = vld [vmem:[%s3489_s22 + $0xd4] sm:$0x1]  ;;  %v2093_v16 = vsel %vm2079_vm5, %v2060_v5, %v4338_v17 }
 0x13f   : > { %v1337_v42 = vshll.u32 %v4387_v21, 16  ;;  %v1644_v28 = vunpack.c.l.b16 %v2957_v31  ;;  %v2126_v17 = vsel %vm2112_vm6, %v2093_v16, %v4267_v63  ;;  %v1842_v49 = vshrl.u32 %v4376_v29, 16 }
 0x140   : > { %v1840_v46 = vsel %vm635_vm0, %v4357_v40, %v1839_v47  ;;  %v954_v47 = vrot.slane %v3404_v3, 1  ;;  %v1467_v9 = vrot.slane %v4387_v21, 1 }
 0x141   : > { %v1660_v35 = vpack.c.b16 %v1644_v28, %v1644_v28 }
 0x142   : > { %1491 = vrot.lane.b32.xlu1 %v1456_v39, %s3435_s26  ;;  %v956_v57 = vsel %vm908_vm1, %v954_v47, %v955_v60  ;;  %v3334_v60 = vld [vmem:[%s3489_s22 + $0x78] sm:$0xff]  }
 0x143   : > { %1603 = vrot.lane.b32.xlu0 %v4293_v12, %s3437_s28  ;;  %1497 = vrot.lane.b32.xlu2 %v1465_v27, %s3435_s26  ;;  %v3271_v12 = vld [vmem:[%s3489_s22 + $0xc0] sm:$0xf0]  ;;  %v2087_v27 = vsel %vm2079_vm5, %v2054_v20, %v4229_v11  ;;  %v1849_v26 = vshll.u32 %v1660_v35, 16  ;;  %v1979_v31 = vrot.slane %v1660_v35, 1 }
 0x144   : > { %v1348_v43 = vpop.permute.xlu1 %1347  ;;  %v4355_v25 = vpop.f32.mrf.mxu0  ;;  %v3273_v54 = vor.u32 %v3272_v36, %v3271_v12  ;;  %v3248_v12 = vld [vmem:[%s3489_s22 + $0xc0] sm:$0xe]  ;;  %v1844_v36 = vshll.u32 %v4376_v29, 16 }
 0x145   : > { %v1476_v48 = vpop.permute.xlu0 %1475  ;;  %v4361_v23 = vpop.permute.xlu2 %848  ;;  %v2120_v52 = vsel %vm2112_vm6, %v2087_v27, %v1348_v43  ;;  %v3249_v59 = vor.u32 %v3248_v12, %v3247_v55 }
 0x146   : > { %v1975_v39 = vrot.slane %v3273_v54, 1  ;;  %v2153_v11 = vsel %vm2145_vm7, %v2120_v52, %v1476_v48  ;;  %v1339_v48 = vrot.slane %v1337_v42, 1  ;;  %v3406_v54 = vld [vmem:[%s3489_s22 + $0xcc] sm:$0xe]  ;;  %v1846_v61 = vrot.slane %v1844_v36, 1 }
 0x147   : > { %v2186_v4 = vsel %vm2178_vm8, %v2153_v11, %v4302_v22  ;;  %v1466_v20 = vrot.slane %v3249_v59, 1  ;;  %v3407_v21 = vor.u32 %v3406_v54, %v4379_v10  ;;  %v2035_v16 = vsel %vm2013_vm3, %v3334_v60, %v4361_v23 }
 0x148   : > { %v1977_v33 = vsel %vm908_vm1, %v1975_v39, %v1976_v8  ;;  %v1340_v63 = vsel %vm635_vm0, %v4357_v40, %v1339_v48  ;;  %v1847_v40 = vor.u32 %v1846_v61, %v1842_v49  ;;  %v1851_v8 = vrot.slane %v1849_v26, 1 }
 0x149   : > { %v1978_v3 = vrot.slane %v3407_v21, 1 }
 0x14a   : > { %1609 = vrot.lane.b32.xlu1 %v4309_v44, %s3437_s28 }
 0x14b   : > { %v4373_v1 = vpop.f32.mrf.mxu1  ;;  %1881 = vrot.lane.b32.xlu0 %v1840_v46, %s3438_s29  ;;  %1875 = vrot.lane.b32.xlu2 %v1804_v45, %s3438_s29  ;;  %v1980_v2 = vsel %vm908_vm1, %v1978_v3, %v1979_v31 }
 0x14c   : > { %v1482_v38 = vpop.permute.xlu1 %1481  ;;  %v4390_v41 = vpop.f32.mrf.mxu0 }
 0x14d   : > { %v3107_v14 = vpack.c.bf16 %v4390_v41, %v4355_v25  ;;  %v1594_v24 = vpop.permute.xlu0 %1593  ;;  %v4397_v32 = vpop.permute.xlu2 %983  ;;  %v2159_v46 = vsel %vm2145_vm7, %v2126_v17, %v1482_v38 }
 0x14e   : > { %v2192_v22 = vsel %vm2178_vm8, %v2159_v46, %v1594_v24  ;;  %v1468_v24 = vsel %vm908_vm1, %v1466_v20, %v1467_v9 }
 0x14f   : > { %3274 = vst [vmem:[%s4250_s14 + $0x8] sm:$0xff] %v3107_v14   ;;  %v2225_v15 = vsel %vm2211_vm9, %v2192_v22, %v4341_v30  ;;  %v1852_v30 = vsel %vm635_vm0, %v1847_v40, %v1851_v8 }
 0x152   : > { %2003 = vrot.lane.b32.xlu1 %v1968_v34, %s3439_s30 }
 0x153   : > { %v4414_v6 = vpop.f32.mrf.mxu1  ;;  %858 = vrot.lane.b32.xlu0 %v827_v0, %s3433_s24  ;;  %2009 = vrot.lane.b32.xlu2 %v1977_v33, %s3439_s30  ;;  %s301_s24 = scalar_lea.vmem %s4728_s4, %s4734_s15 }
 0x154   : > { %v3122_v43 = vpack.c.bf16 %v4414_v6, %v4373_v1  ;;  %v1860_v51 = vpop.permute.xlu1 %1859 }
 0x155   : > { %v2219_v37 = vsel %vm2211_vm9, %v2186_v4, %v1860_v51  ;;  %v1988_v50 = vpop.permute.xlu0 %1987  ;;  %v1362_v56 = vpop.permute.xlu2 %1361 }
 0x156   : > { %3277 = vst [vmem:[%s4250_s14 + $0x20] sm:$0xff] %v3122_v43   ;;  %v2252_v45 = vsel %vm2244_vm10, %v2219_v37, %v1988_v50 }
 0x157   : > { %2985 = vmatmul.msk.bf16.gmra.mxu0 %vm2297_vm11, %v2252_v45 }
 0x15a   : > { %987 = vrot.lane.b32.xlu1 %v956_v57, %s3434_s25 }
 0x15b   : > { %1371 = vrot.lane.b32.xlu0 %v1340_v63, %s3436_s27  ;;  %1099 = vrot.lane.b32.xlu2 %v4309_v44, %s3432_s23 }
 0x15c   : > { %v1994_v38 = vpop.permute.xlu1 %1993 }
 0x15d   : > { %v2258_v39 = vsel %vm2244_vm10, %v2225_v15, %v1994_v38  ;;  %v855_v14 = vpop.permute.xlu0 %854  ;;  %v1496_v34 = vpop.permute.xlu2 %1495 }
 0x15e   : > { %2988 = vmatmul.msk.bf16.gmra.mxu1 %vm2297_vm11, %v2258_v39  ;;  %v2041_v4 = vsel %vm2013_vm3, %v3982_v58, %v855_v14 }
 0x15f   : > { %v2074_v17 = vsel %vm2046_vm4, %v2041_v4, %v4397_v32 }
 0x162   : > { %1499 = vrot.lane.b32.xlu1 %v1468_v24, %s3435_s26 }
 0x163   : > { %1883 = vrot.lane.b32.xlu0 %v1852_v30, %s3438_s29  ;;  %1611 = vrot.lane.b32.xlu2 %v4376_v29, %s3437_s28 }
 0x164   : > { %v978_v18 = vpop.permute.xlu1 %977 }
 0x165   : > { %v1090_v44 = vpop.permute.xlu0 %1089  ;;  %v843_v27 = vpop.permute.xlu2 %842  ;;  %v2068_v55 = vsel %vm2046_vm4, %v2035_v16, %v978_v18 }
 0x166   : > { %v2101_v12 = vsel %vm2079_vm5, %v2068_v55, %v1090_v44  ;;  %v2029_v20 = vsel %vm2013_vm3, %v4057_v13, %v843_v27 }
 0x167   : > { %v2134_v35 = vsel %vm2112_vm6, %v2101_v12, %v1362_v56 }
 0x16a   : > { %2011 = vrot.lane.b32.xlu1 %v1980_v2, %s3439_s30  ;;  %v4459_v0 = vpop.f32.mrf.mxu2 }
 0x16c   : > { %v1096_v10 = vpop.permute.xlu1 %1095 }
 0x16d   : > { %v1368_v42 = vpop.permute.xlu0 %1367  ;;  %v972_v52 = vpop.permute.xlu2 %971  ;;  %v2107_v37 = vsel %vm2079_vm5, %v2074_v17, %v1096_v10 }
 0x16e   : > { %v2140_v59 = vsel %vm2112_vm6, %v2107_v37, %v1368_v42  ;;  %v2062_v39 = vsel %vm2046_vm4, %v2029_v20, %v972_v52 }
 0x16f   : > { %v2173_v54 = vsel %vm2145_vm7, %v2140_v59, %v1496_v34 }
 0x172   : > { %v4461_v33 = vpop.f32.mrf.mxu2 }
 0x173   : > { %v3142_v5 = vpack.c.bf16 %v4461_v33, %v4459_v0 }
 0x174   : > { %v1490_v28 = vpop.permute.xlu1 %1489 }
 0x175   : > { %3281 = vst [vmem:[%s4250_s14 + $0x40] sm:$0xff] %v3142_v5   ;;  %v1602_v29 = vpop.permute.xlu0 %1601  ;;  %v1084_v11 = vpop.permute.xlu2 %1083  ;;  %v2167_v23 = vsel %vm2145_vm7, %v2134_v35, %v1490_v28 }
 0x176   : > { %v2200_v50 = vsel %vm2178_vm8, %v2167_v23, %v1602_v29  ;;  %v2095_v40 = vsel %vm2079_vm5, %v2062_v39, %v1084_v11  ;;  %v3335_v29 = vld [vmem:[%s3489_s22 + $0xa8] sm:$0xff]  }
 0x17c   : > { %v1608_v47 = vpop.permute.xlu1 %1607 }
 0x17d   : > { %v4469_v43 = vpop.f32.mrf.mxu0  ;;  %v1874_v51 = vpop.permute.xlu0 %1873  ;;  %v2206_v22 = vsel %vm2178_vm8, %v2173_v54, %v1608_v47 }
 0x17e   : > { %v1596_v48 = vpop.permute.xlu2 %1595  ;;  %v2233_v58 = vsel %vm2211_vm9, %v2200_v50, %v1874_v51 }
 0x184   : > { %v1880_v36 = vpop.permute.xlu1 %1879  ;;  %v4481_v57 = vpop.f32.mrf.mxu1 }
 0x185   : > { %v4485_v46 = vpop.f32.mrf.mxu0  ;;  %v2002_v45 = vpop.permute.xlu0 %2001  ;;  %v2239_v63 = vsel %vm2211_vm9, %v2206_v22, %v1880_v36 }
 0x186   : > { %v3112_v56 = vpack.c.bf16 %v4485_v46, %v4469_v43  ;;  %v2266_v32 = vsel %vm2244_vm10, %v2233_v58, %v2002_v45  ;;  %v851_v61 = vpop.permute.xlu2 %850 }
 0x187   : > { %2992 = vmatmul.msk.bf16.gmra.mxu2 %vm2297_vm11, %v2266_v32  ;;  %v2037_v60 = vsel %vm2013_vm3, %v4177_v7, %v851_v61 }
 0x188   : > { %3275 = vst [vmem:[%s4250_s14 + $0x10] sm:$0xff] %v3112_v56  }
 0x18c   : > { %v2008_v49 = vpop.permute.xlu1 %2007  ;;  %v4498_v9 = vpop.f32.mrf.mxu1 }
 0x18d   : > { %v2272_v26 = vsel %vm2244_vm10, %v2239_v63, %v2008_v49  ;;  %v3127_v38 = vpack.c.bf16 %v4498_v9, %v4481_v57  ;;  %v1356_v15 = vpop.permute.xlu0 %1355 }
 0x18e   : > { %2995 = vmatmul.msk.bf16.gmra.mxu3 %vm2297_vm11, %v2272_v26  ;;  %v2128_v14 = vsel %vm2112_vm6, %v2095_v40, %v1356_v15  ;;  %v986_v21 = vpop.permute.xlu2 %985 }
 0x18f   : > { %3278 = vst [vmem:[%s4250_s14 + $0x28] sm:$0xff] %v3127_v38  }
 0x194   : > { %v1484_v8 = vpop.permute.xlu1 %1483 }
 0x195   : > { %v2161_v24 = vsel %vm2145_vm7, %v2128_v14, %v1484_v8  ;;  %v1868_v13 = vpop.permute.xlu0 %1867 }
 0x196   : > { %v2194_v34 = vsel %vm2178_vm8, %v2161_v24, %v1596_v48  ;;  %v1364_v44 = vpop.permute.xlu2 %1363 }
 0x197   : > { %v2227_v30 = vsel %vm2211_vm9, %v2194_v34, %v1868_v13 }
 0x19c   : > { %v1996_v3 = vpop.permute.xlu1 %1995 }
 0x19d   : > { %v2260_v31 = vsel %vm2244_vm10, %v2227_v30, %v1996_v3  ;;  %v857_v18 = vpop.permute.xlu0 %856 }
 0x19e   : > { %2989 = vmatmul.msk.bf16.gmra.mxu1 %vm2297_vm11, %v2260_v31  ;;  %v1498_v10 = vpop.permute.xlu2 %1497  ;;  %v2043_v11 = vsel %vm2013_vm3, %v3335_v29, %v857_v18 }
 0x19f   : > { %v2076_v16 = vsel %vm2046_vm4, %v2043_v11, %v986_v21 }
 0x1a4   : > { %v980_v2 = vpop.permute.xlu1 %979 }
 0x1a5   : > { %v1092_v27 = vpop.permute.xlu0 %1091  ;;  %v2070_v55 = vsel %vm2046_vm4, %v2037_v60, %v980_v2 }
 0x1a6   : > { %v1876_v5 = vpop.permute.xlu2 %1875  ;;  %v2103_v4 = vsel %vm2079_vm5, %v2070_v55, %v1092_v27 }
 0x1a7   : > { %v2136_v23 = vsel %vm2112_vm6, %v2103_v4, %v1364_v44 }
 0x1ac   : > { %v1098_v42 = vpop.permute.xlu1 %1097 }
 0x1ad   : > { %v1370_v52 = vpop.permute.xlu0 %1369  ;;  %v2109_v51 = vsel %vm2079_vm5, %v2076_v16, %v1098_v42 }
 0x1ae   : > { %v2142_v12 = vsel %vm2112_vm6, %v2109_v51, %v1370_v52  ;;  %v2010_v17 = vpop.permute.xlu2 %2009 }
 0x1af   : > { %v2175_v36 = vsel %vm2145_vm7, %v2142_v12, %v1498_v10 }
 0x1b4   : > { %v1492_v28 = vpop.permute.xlu1 %1491 }
 0x1b5   : > { %v1604_v47 = vpop.permute.xlu0 %1603  ;;  %v2169_v50 = vsel %vm2145_vm7, %v2136_v23, %v1492_v28 }
 0x1b6   : > { %v2202_v58 = vsel %vm2178_vm8, %v2169_v50, %v1604_v47  ;;  %v1100_v39 = vpop.permute.xlu2 %1099 }
 0x1b7   : > { %v2235_v32 = vsel %vm2211_vm9, %v2202_v58, %v1876_v5  ;;  %v2487_v5 = vadd.f32 %v4252_v62, %v4220_v19 }
 0x1b9   : > { %v2488_v29 = vadd.f32 %v2487_v5, %v4355_v25 }
 0x1ba   : > { %v4521_v35 = vpop.f32.mrf.mxu2 }
 0x1bb   : > { %v2489_v47 = vadd.f32 %v2488_v29, %v4390_v41 }
 0x1bc   : > { %v1610_v48 = vpop.permute.xlu1 %1609 }
 0x1bd   : > { %v2208_v7 = vsel %vm2178_vm8, %v2175_v36, %v1610_v48  ;;  %v1882_v37 = vpop.permute.xlu0 %1881  ;;  %v2490_v60 = vadd.f32 %v2489_v47, %v4469_v43 }
 0x1be   : > { %v2241_v59 = vsel %vm2211_vm9, %v2208_v7, %v1882_v37  ;;  %v1612_v34 = vpop.permute.xlu2 %1611 }
 0x1bf   : > { %v2274_v56 = vsel %vm2244_vm10, %v2241_v59, %v2010_v17  ;;  %v2491_v55 = vadd.f32 %v2490_v60, %v4485_v46 }
 0x1c0   : > { %2996 = vmatmul.msk.bf16.gmra.mxu3 %vm2297_vm11, %v2274_v56 }
 0x1c1   : > { %v4529_v45 = vpop.f32.mrf.mxu3 }
 0x1c2   : > { %v4534_v22 = vpop.f32.mrf.mxu2 }
 0x1c3   : > { %v3147_v63 = vpack.c.bf16 %v4534_v22, %v4521_v35 }
 0x1c4   : > { %v2004_v54 = vpop.permute.xlu1 %2003 }
 0x1c5   : > { %v2268_v49 = vsel %vm2244_vm10, %v2235_v32, %v2004_v54  ;;  %3282 = vst [vmem:[%s4250_s14 + $0x48] sm:$0xff] %v3147_v63   ;;  %v859_v61 = vpop.permute.xlu0 %858 }
 0x1c6   : > { %2993 = vmatmul.msk.bf16.gmra.mxu2 %vm2297_vm11, %v2268_v49  ;;  %v2045_v38 = vsel %vm2013_vm3, %v4319_v53, %v859_v61 }
 0x1c9   : > { %v4541_v26 = vpop.f32.mrf.mxu3 }
 0x1ca   : > { %v3162_v20 = vpack.c.bf16 %v4541_v26, %v4529_v45 }
 0x1cc   : > { %3285 = vst [vmem:[%s4250_s14 + $0x60] sm:$0xff] %v3162_v20   ;;  %v988_v15 = vpop.permute.xlu1 %987 }
 0x1cd   : > { %v2078_v40 = vsel %vm2046_vm4, %v2045_v38, %v988_v15  ;;  %v1372_v8 = vpop.permute.xlu0 %1371 }
 0x1ce   : > { %v2111_v14 = vsel %vm2079_vm5, %v2078_v40, %v1100_v39 }
 0x1cf   : > { %v2144_v21 = vsel %vm2112_vm6, %v2111_v14, %v1372_v8 }
 0x1d4   : > { %v1500_v24 = vpop.permute.xlu1 %1499  ;;  %v4552_v30 = vpop.f32.mrf.mxu0 }
 0x1d5   : > { %v2177_v13 = vsel %vm2145_vm7, %v2144_v21, %v1500_v24  ;;  %v1884_v3 = vpop.permute.xlu0 %1883  ;;  %v2492_v12 = vadd.f32 %v2491_v55, %v4552_v30 }
 0x1d6   : > { %v2210_v53 = vsel %vm2178_vm8, %v2177_v13, %v1612_v34 }
 0x1d7   : > { %v2243_v18 = vsel %vm2211_vm9, %v2210_v53, %v1884_v3 }
 0x1db   : > { %v4555_v31 = vpop.f32.mrf.mxu1 }
 0x1dc   : > { %v2012_v44 = vpop.permute.xlu1 %2011  ;;  %v4559_v27 = vpop.f32.mrf.mxu0 }
 0x1dd   : > { %v2276_v2 = vsel %vm2244_vm10, %v2243_v18, %v2012_v44  ;;  %v3117_v10 = vpack.c.bf16 %v4559_v27, %v4552_v30  ;;  %v2493_v48 = vadd.f32 %v2492_v12, %v4559_v27 }
 0x1de   : > { %2997 = vmatmul.msk.bf16.gmra.mxu3 %vm2297_vm11, %v2276_v2 }
 0x1df   : > { %3276 = vst [vmem:[%s4250_s14 + $0x18] sm:$0xff] %v3117_v10   ;;  %v2494_v23 = vadd.f32 %v2493_v48, %v4373_v1 }
 0x1e1   : > { %v2495_v7 = vadd.f32 %v2494_v23, %v4414_v6 }
 0x1e3   : > { %v4565_v42 = vpop.f32.mrf.mxu1  ;;  %v2496_v59 = vadd.f32 %v2495_v7, %v4481_v57 }
 0x1e4   : > { %v3132_v52 = vpack.c.bf16 %v4565_v42, %v4555_v31 }
 0x1e5   : > { %v2497_v58 = vadd.f32 %v2496_v59, %v4498_v9 }
 0x1e6   : > { %3279 = vst [vmem:[%s4250_s14 + $0x30] sm:$0xff] %v3132_v52  }
 0x1e7   : > { %v2498_v56 = vadd.f32 %v2497_v58, %v4555_v31 }
 0x1e9   : > { %v2499_v32 = vadd.f32 %v2498_v56, %v4565_v42 }
 0x20a   : > { %v4570_v28 = vpop.f32.mrf.mxu2 }
 0x211   : > { %v4575_v11 = vpop.f32.mrf.mxu3 }
 0x212   : > { %v4579_v16 = vpop.f32.mrf.mxu2 }
 0x213   : > { %v3152_v51 = vpack.c.bf16 %v4579_v16, %v4570_v28 }
 0x215   : > { %3283 = vst [vmem:[%s4250_s14 + $0x50] sm:$0xff] %v3152_v51  }
 0x219   : > { %v4586_v4 = vpop.f32.mrf.mxu3 }
 0x21a   : > { %v3167_v36 = vpack.c.bf16 %v4586_v4, %v4575_v11 }
 0x21b   : > { %v4591_v17 = vpop.f32.mrf.mxu1 }
 0x21c   : > { %3286 = vst [vmem:[%s4250_s14 + $0x68] sm:$0xff] %v3167_v36   ;;  %v2500_v54 = vadd.f32 %v2499_v32, %v4591_v17 }
 0x223   : > { %v4596_v37 = vpop.f32.mrf.mxu1 }
 0x224   : > { %v3137_v50 = vpack.c.bf16 %v4596_v37, %v4591_v17  ;;  %v2501_v63 = vadd.f32 %v2500_v54, %v4596_v37 }
 0x226   : > { %3280 = vst [vmem:[%s4250_s14 + $0x38] sm:$0xff] %v3137_v50   ;;  %v2502_v49 = vadd.f32 %v2501_v63, %v4459_v0 }
 0x228   : > { %v2503_v61 = vadd.f32 %v2502_v49, %v4461_v33 }
 0x22a   : > { %v2504_v20 = vadd.f32 %v2503_v61, %v4521_v35 }
 0x22c   : > { %v2505_v15 = vadd.f32 %v2504_v20, %v4534_v22 }
 0x22e   : > { %v2506_v40 = vadd.f32 %v2505_v15, %v4570_v28 }
 0x230   : > { %v2507_v14 = vadd.f32 %v2506_v40, %v4579_v16 }
 0x243   : > { %v2413_v38 = vpop.f32.mrf.mxu3 }
 0x249   : > { %v4611_v39 = vpop.f32.mrf.mxu2 }
 0x24a   : > { %v2508_v21 = vadd.f32 %v2507_v14, %v4611_v39 }
 0x24b   : > { %v2415_v8 = vpop.f32.mrf.mxu3 }
 0x24c   : > { %v3172_v24 = vpack.c.bf16 %v2415_v8, %v2413_v38 }
 0x24e   : > { %3287 = vst [vmem:[%s4250_s14 + $0x70] sm:$0xff] %v3172_v24  }
 0x251   : > { %v4617_v13 = vpop.f32.mrf.mxu2 }
 0x252   : > { %v3157_v34 = vpack.c.bf16 %v4617_v13, %v4611_v39  ;;  %v2509_v53 = vadd.f32 %v2508_v21, %v4617_v13 }
 0x254   : > { %3284 = vst [vmem:[%s4250_s14 + $0x58] sm:$0xff] %v3157_v34   ;;  %v2510_v3 = vadd.f32 %v2509_v53, %v4529_v45 }
 0x256   : > { %v2511_v18 = vadd.f32 %v2510_v3, %v4541_v26 }
 0x258   : > { %v2512_v44 = vadd.f32 %v2511_v18, %v4575_v11 }
 0x25a   : > { %v2513_v2 = vadd.f32 %v2512_v44, %v4586_v4 }
 0x25c   : > { %v2514_v52 = vadd.f32 %v2513_v2, %v2413_v38 }
 0x25e   : > { %v2515_v5 = vadd.f32 %v2514_v52, %v2415_v8 }
 0x261   : > { %v2418_v10 = vpop.f32.mrf.mxu3 }
 0x262   : > { %v2516_v29 = vadd.f32 %v2515_v5, %v2418_v10 }
 0x269   : > { %v2420_v47 = vpop.f32.mrf.mxu3 }
 0x26a   : > { %v3177_v60 = vpack.c.bf16 %v2420_v47, %v2418_v10  ;;  %v2517_v51 = vadd.f32 %v2516_v29, %v2420_v47 }
 0x26c   : > { %3288 = vst [vmem:[%s4250_s14 + $0x78] sm:$0xff] %v3177_v60   ;;  %v2518_v55 = vrot.slane %v2517_v51, 4 }
 0x26e   : > { %v2519_v12 = vadd.f32 %v2518_v55, %v2517_v51 }
 0x270   : > { %v2520_v48 = vrot.slane %v2519_v12, 2 }
 0x272   : > { %v2521_v36 = vadd.f32 %v2520_v48, %v2519_v12 }
 0x274   : > { %v2522_v23 = vrot.slane %v2521_v36, 1 }
 0x276   : > { %v2523_v7 = vadd.f32 %v2522_v23, %v2521_v36 }
 0x278   : > { %v4632_v50 = vmul.f32 0.00390625, %v2523_v7 }
 0x27a   : > { %2557 = vst [vmem:[%s292_s21] sm:$0x1] %v4632_v50  ;;  %v4636_v59 = vsub.f32 %v2413_v38, %v4632_v50  ;;  %v4639_v58 = vsub.f32 %v2415_v8, %v4632_v50  ;;  %v4642_v56 = vsub.f32 %v2418_v10, %v4632_v50  ;;  %v4645_v32 = vsub.f32 %v2420_v47, %v4632_v50 }
 0x27b   : > { %v2525_v54 = vsub.f32 %v4220_v19, %v4632_v50  ;;  %v2526_v63 = vsub.f32 %v4252_v62, %v4632_v50  ;;  %v2527_v49 = vsub.f32 %v4355_v25, %v4632_v50  ;;  %v2528_v38 = vsub.f32 %v4390_v41, %v4632_v50 }
 0x27c   : > { %v2529_v15 = vsub.f32 %v4469_v43, %v4632_v50  ;;  %v2530_v14 = vsub.f32 %v4485_v46, %v4632_v50  ;;  %v2531_v62 = vsub.f32 %v4552_v30, %v4632_v50  ;;  %v2532_v34 = vsub.f32 %v4559_v27, %v4632_v50 }
 0x27d   : > { %v2558_v61 = vmul.f32 %v2525_v54, %v2525_v54  ;;  %v2559_v20 = vmul.f32 %v2526_v63, %v2526_v63  ;;  %v2560_v40 = vmul.f32 %v2527_v49, %v2527_v49  ;;  %v2561_v19 = vmul.f32 %v2528_v38, %v2528_v38 }
 0x27e   : > { %v2562_v21 = vmul.f32 %v2529_v15, %v2529_v15  ;;  %v2563_v53 = vmul.f32 %v2530_v14, %v2530_v14  ;;  %v2533_v43 = vsub.f32 %v4373_v1, %v4632_v50  ;;  %v2564_v3 = vmul.f32 %v2531_v62, %v2531_v62 }
 0x27f   : > { %v2590_v8 = vadd.f32 %v2559_v20, %v2558_v61  ;;  %v2534_v46 = vsub.f32 %v4414_v6, %v4632_v50  ;;  %v2565_v44 = vmul.f32 %v2532_v34, %v2532_v34  ;;  %v2535_v30 = vsub.f32 %v4481_v57, %v4632_v50 }
 0x280   : > { %v2566_v10 = vmul.f32 %v2533_v43, %v2533_v43  ;;  %v2536_v27 = vsub.f32 %v4498_v9, %v4632_v50  ;;  %v2537_v1 = vsub.f32 %v4555_v31, %v4632_v50  ;;  %v2538_v6 = vsub.f32 %v4565_v42, %v4632_v50 }
 0x281   : > { %v2591_v24 = vadd.f32 %v2590_v8, %v2560_v40  ;;  %v2567_v5 = vmul.f32 %v2534_v46, %v2534_v46  ;;  %v2568_v47 = vmul.f32 %v2535_v30, %v2535_v30  ;;  %v2539_v57 = vsub.f32 %v4591_v17, %v4632_v50 }
 0x282   : > { %v2569_v51 = vmul.f32 %v2536_v27, %v2536_v27  ;;  %v2570_v12 = vmul.f32 %v2537_v1, %v2537_v1  ;;  %v2540_v9 = vsub.f32 %v4596_v37, %v4632_v50  ;;  %v2571_v36 = vmul.f32 %v2538_v6, %v2538_v6 }
 0x283   : > { %v2592_v25 = vadd.f32 %v2591_v24, %v2561_v19  ;;  %v2541_v31 = vsub.f32 %v4459_v0, %v4632_v50  ;;  %v2572_v7 = vmul.f32 %v2539_v57, %v2539_v57  ;;  %v2542_v42 = vsub.f32 %v4461_v33, %v4632_v50 }
 0x284   : > { %v2573_v63 = vmul.f32 %v2540_v9, %v2540_v9  ;;  %v2543_v17 = vsub.f32 %v4521_v35, %v4632_v50  ;;  %v2544_v37 = vsub.f32 %v4534_v22, %v4632_v50  ;;  %v2545_v0 = vsub.f32 %v4570_v28, %v4632_v50 }
 0x285   : > { %v2593_v41 = vadd.f32 %v2592_v25, %v2562_v21  ;;  %v2574_v61 = vmul.f32 %v2541_v31, %v2541_v31  ;;  %v2575_v38 = vmul.f32 %v2542_v42, %v2542_v42  ;;  %v2546_v33 = vsub.f32 %v4579_v16, %v4632_v50 }
 0x286   : > { %v2576_v40 = vmul.f32 %v2543_v17, %v2543_v17  ;;  %v2577_v14 = vmul.f32 %v2544_v37, %v2544_v37  ;;  %v2547_v35 = vsub.f32 %v4611_v39, %v4632_v50  ;;  %v2578_v24 = vmul.f32 %v2545_v0, %v2545_v0 }
 0x287   : > { %v2594_v18 = vadd.f32 %v2593_v41, %v2563_v53  ;;  %v2548_v22 = vsub.f32 %v4617_v13, %v4632_v50  ;;  %v2579_v21 = vmul.f32 %v2546_v33, %v2546_v33  ;;  %v2549_v28 = vsub.f32 %v4529_v45, %v4632_v50 }
 0x288   : > { %v2580_v34 = vmul.f32 %v2547_v35, %v2547_v35  ;;  %v2550_v16 = vsub.f32 %v4541_v26, %v4632_v50  ;;  %v2551_v39 = vsub.f32 %v4575_v11, %v4632_v50  ;;  %v2552_v13 = vsub.f32 %v4586_v4, %v4632_v50 }
 0x289   : > { %v2595_v2 = vadd.f32 %v2594_v18, %v2564_v3  ;;  %v2581_v41 = vmul.f32 %v2548_v22, %v2548_v22  ;;  %v2582_v3 = vmul.f32 %v2549_v28, %v2549_v28  ;;  %v2586_v26 = vmul.f32 %v4636_v59, %v4636_v59 }
 0x28a   : > { %v2583_v46 = vmul.f32 %v2550_v16, %v2550_v16  ;;  %v2585_v45 = vmul.f32 %v2552_v13, %v2552_v13  ;;  %v2587_v27 = vmul.f32 %v4639_v58, %v4639_v58  ;;  %v2589_v4 = vmul.f32 %v4645_v32, %v4645_v32 }
 0x28b   : > { %v2596_v52 = vadd.f32 %v2595_v2, %v2565_v44  ;;  %v2584_v2 = vmul.f32 %v2551_v39, %v2551_v39 }
 0x28d   : > { %v2597_v29 = vadd.f32 %v2596_v52, %v2566_v10 }
 0x28f   : > { %v2598_v60 = vadd.f32 %v2597_v29, %v2567_v5  ;;  %v2588_v5 = vmul.f32 %v4642_v56, %v4642_v56 }
 0x291   : > { %v2599_v55 = vadd.f32 %v2598_v60, %v2568_v47 }
 0x293   : > { %v2600_v48 = vadd.f32 %v2599_v55, %v2569_v51 }
 0x295   : > { %v2601_v23 = vadd.f32 %v2600_v48, %v2570_v12 }
 0x297   : > { %v2602_v54 = vadd.f32 %v2601_v23, %v2571_v36 }
 0x299   : > { %v2603_v49 = vadd.f32 %v2602_v54, %v2572_v7 }
 0x29b   : > { %v2604_v20 = vadd.f32 %v2603_v49, %v2573_v63 }
 0x29d   : > { %v2605_v15 = vadd.f32 %v2604_v20, %v2574_v61 }
 0x29f   : > { %v2606_v8 = vadd.f32 %v2605_v15, %v2575_v38 }
 0x2a1   : > { %v2607_v19 = vadd.f32 %v2606_v8, %v2576_v40 }
 0x2a3   : > { %v2608_v62 = vadd.f32 %v2607_v19, %v2577_v14 }
 0x2a5   : > { %v2609_v25 = vadd.f32 %v2608_v62, %v2578_v24 }
 0x2a7   : > { %v2610_v53 = vadd.f32 %v2609_v25, %v2579_v21 }
 0x2a9   : > { %v2611_v43 = vadd.f32 %v2610_v53, %v2580_v34 }
 0x2ab   : > { %v2612_v18 = vadd.f32 %v2611_v43, %v2581_v41 }
 0x2ad   : > { %v2613_v44 = vadd.f32 %v2612_v18, %v2582_v3 }
 0x2af   : > { %v2614_v30 = vadd.f32 %v2613_v44, %v2583_v46 }
 0x2b1   : > { %v2615_v10 = vadd.f32 %v2614_v30, %v2584_v2 }
 0x2b3   : > { %v2616_v52 = vadd.f32 %v2615_v10, %v2585_v45 }
 0x2b5   : > { %v2617_v11 = vadd.f32 %v2616_v52, %v2586_v26 }
 0x2b7   : > { %v2618_v29 = vadd.f32 %v2617_v11, %v2587_v27 }
 0x2b9   : > { %v2619_v50 = vadd.f32 %v2618_v29, %v2588_v5 }
 0x2bb   : > { %v2620_v1 = vadd.f32 %v2619_v50, %v2589_v4 }
 0x2bd   : > { %v2621_v47 = vrot.slane %v2620_v1, 4 }
 0x2bf   : > { %v2622_v60 = vadd.f32 %v2621_v47, %v2620_v1 }
 0x2c1   : > { %v2623_v6 = vrot.slane %v2622_v60, 2 }
 0x2c3   : > { %v2624_v51 = vadd.f32 %v2623_v6, %v2622_v60 }
 0x2c5   : > { %v2625_v55 = vrot.slane %v2624_v51, 1 }
 0x2c7   : > { %v2626_v59 = vadd.f32 %v2625_v55, %v2624_v51 }
 0x2c9   : > { %2627 = vst [vmem:[%s301_s24] sm:$0x1] %v2626_v59 }
 0x2ca PF: > { %s15_s17 = sadd.s32 1, %s3430_s17   ;;  %s4729_s15 = smov %s3426_s16 }
 0x2cb   : > { %p12_p5 = scmp.ge.s32.totalorder %s15_s17, 4   ;;  %s4730_s16 = smov %s4732_s18 }
 0x2cd   :  { %14 = sbr.rel (!%p12_p5) target bundleno = 2 (0x2), region = 88 }

</bundles_post_ra>
